<compile_context>
chip_gen: v5e
topology: v5e:2x2
jax: 0.10.0
libtpu: 0.0.40
codegen_flags: <defaults>
</compile_context>

<pallas_src>
import functools
import math

import jax
import jax.numpy as jnp
from jax.experimental import pallas as pl
from jax.experimental.pallas import tpu as pltpu


def bert_selfatt_kernel(
    x_ref,        # (Bt, S, H)   input block, f32
    mask_ref,     # (Bt, 1, 1, S) additive attention mask, f32
    wqkv_ref,     # (H, 3H) [in, out] compute dtype; Q part pre-scaled by 1/sqrt(d)
    bqkv_ref,     # (1, 3H) f32;      Q part pre-scaled by 1/sqrt(d)
    wo_ref,       # (H, H)  [in, out] compute dtype
    bo_ref,       # (1, H)  f32
    gamma_ref, beta_ref,  # (1, H) f32 LayerNorm params
    out_ref,      # (Bt, S, H)
    ctx_ref,      # scratch: (Bt*S, H) compute dtype, per-head context staging
    *,
    num_heads: int,
    compute_dtype,
    exp_dtype,
):
    bt, seq, hidden = x_ref.shape
    head_dim = hidden // num_heads
    rows = bt * seq
    cdt = compute_dtype
    approx_recip = cdt != jnp.float32

    # ---- fused Q/K/V projection on the flattened (Bt*S, H) block ----
    x2d = x_ref[...].reshape(rows, hidden)           # f32, kept for residual
    xc = x2d.astype(cdt)

    qkv = jnp.dot(xc, wqkv_ref[...],
                  preferred_element_type=jnp.float32) + bqkv_ref[...]
    q3 = qkv[:, 0:hidden].reshape(bt, seq, hidden).astype(cdt)
    k3 = qkv[:, hidden:2 * hidden].reshape(bt, seq, hidden).astype(cdt)
    v3 = qkv[:, 2 * hidden:3 * hidden].reshape(bt, seq, hidden).astype(cdt)

    # mask hoisted & materialized once (JAX does not CSE broadcast_in_dim)
    mask_full = jnp.broadcast_to(mask_ref[...].reshape(bt, 1, seq),
                                 (bt, seq, seq)).astype(jnp.float32)

    # ---- per-head attention; contexts staged into the (Bt*S, H) scratch ----
    for h in range(num_heads):
        lo = h * head_dim
        qh = q3[:, :, lo:lo + head_dim]              # (Bt, S, d)
        kh = k3[:, :, lo:lo + head_dim]
        vh = v3[:, :, lo:lo + head_dim]

        s = jnp.einsum("bqd,bkd->bqk", qh, kh,
                       preferred_element_type=jnp.float32)   # (Bt, S, S)
        s = s + mask_full                            # additive mask over key axis

        m = jnp.max(s, axis=-1, keepdims=True)
        e = jnp.exp((s - m).astype(exp_dtype))       # bf16 exp on v6e/v7x path
        denom = jnp.sum(e.astype(jnp.float32), axis=-1, keepdims=True)
        inv = pl.reciprocal(denom, approx=approx_recip)
        p = (e * inv).astype(cdt)

        ctx = jnp.einsum("bqk,bkd->bqd", p, vh,
                         preferred_element_type=jnp.float32)  # (Bt, S, d)
        ctx_ref[:, lo:lo + head_dim] = ctx.reshape(rows, head_dim).astype(cdt)

    # ---- single K=H output projection + residual + bias ----
    acc = x2d + bo_ref[...] + jnp.dot(ctx_ref[...], wo_ref[...],
                                      preferred_element_type=jnp.float32)

    # ---- LayerNorm in f32 ----
    mu = jnp.mean(acc, axis=-1, keepdims=True)
    centered = acc - mu
    var = jnp.mean(centered * centered, axis=-1, keepdims=True)
    y = centered * jax.lax.rsqrt(var + 1e-12)
    y = y * gamma_ref[...] + beta_ref[...]

    out_ref[...] = y.reshape(bt, seq, hidden).astype(out_ref.dtype)


def bert_selfatt_layer(x, attention_mask, params, *, num_heads,
                       compute_dtype=jnp.bfloat16):
    """x: (B, S, H) f32, attention_mask: (B, 1, 1, S) f32 additive mask."""
    B, S, H = x.shape
    head_dim = H // num_heads
    scale = 1.0 / math.sqrt(head_dim)
    cdt = compute_dtype

    # ---- generation detection (safe string check; no hard dependency) ----
    try:
        kind = jax.devices()[0].device_kind.lower()
    except Exception:
        kind = ""
    is_v5e = "v5" in kind            # v5e EUP has no bf16 path -> keep f32 exp
    exp_dtype = jnp.float32 if (cdt == jnp.float32 or is_v5e) else cdt

    # ---- batch-block size ----
    # Target enough rows per step to fill the MXU (128 on v5e, 256 otherwise),
    # but keep >= 2 grid steps so both v7x TensorCores get work; bt must
    # divide B.  Fall back to bt=1 if S is not sublane-aligned.
    if S % 8 == 0:
        row_target = 128 if is_v5e else 256
        bt = max(1, min(B, -(-row_target // S)))
        if B >= 2:
            bt = min(bt, B // 2)
        while B % bt:
            bt -= 1
    else:
        bt = 1
    grid = (B // bt,)

    # ---- VMEM budget: ~3/4 of physical capacity (48 MiB v7x, 96 MiB v5e/v6e) ----
    try:
        vmem_cap = int(pltpu.get_tpu_info().vmem_capacity_bytes)
    except Exception:
        vmem_cap = 64 * 1024 * 1024
    vmem_limit = min(vmem_cap * 3 // 4, 112 * 1024 * 1024)

    # ---- one-time weight prep on constants ----
    # PyTorch [out, in] -> [in, out]; fuse Q|K|V; fold 1/sqrt(d) into Q weight
    # and bias (in f32, before the bf16 cast); cast matmul weights to cdt.
    wq = params["wq"].T * scale
    wk = params["wk"].T
    wv = params["wv"].T
    wqkv = jnp.concatenate([wq, wk, wv], axis=1).astype(cdt)          # (H, 3H)
    bqkv = jnp.concatenate([params["bq"] * scale, params["bk"],
                            params["bv"]], axis=1)                    # (1, 3H) f32
    wo = params["wo"].T.astype(cdt)                                   # (H, H)

    kernel = functools.partial(bert_selfatt_kernel, num_heads=num_heads,
                               compute_dtype=cdt, exp_dtype=exp_dtype)

    wbytes = jnp.dtype(cdt).itemsize
    cost = pl.CostEstimate(
        flops=int(8 * B * S * H * H + 4 * B * S * S * H),
        transcendentals=int(B * num_heads * S * S + 2 * B * S),
        bytes_accessed=int((2 * B * S * H + B * S) * 4
                           + 4 * H * H * wbytes + 6 * H * 4),
    )

    def build(weight_pipeline_mode):
        kw = ({} if weight_pipeline_mode is None
              else {"pipeline_mode": weight_pipeline_mode})
        # loop-invariant weights / params: constant index_map (no re-DMA);
        # single-buffered when the installed Pallas supports pipeline_mode.
        w_qkv_spec = pl.BlockSpec((H, 3 * H), lambda b: (0, 0), **kw)
        w_o_spec = pl.BlockSpec((H, H), lambda b: (0, 0), **kw)
        vec3_spec = pl.BlockSpec((1, 3 * H), lambda b: (0, 0), **kw)
        vec_spec = pl.BlockSpec((1, H), lambda b: (0, 0), **kw)

        return pl.pallas_call(
            kernel,
            out_shape=jax.ShapeDtypeStruct((B, S, H), x.dtype),
            grid_spec=pltpu.PrefetchScalarGridSpec(
                num_scalar_prefetch=0,
                grid=grid,
                in_specs=[
                    pl.BlockSpec((bt, S, H), lambda b: (b, 0, 0)),        # x
                    pl.BlockSpec((bt, 1, 1, S), lambda b: (b, 0, 0, 0)),  # mask
                    w_qkv_spec, vec3_spec,   # fused QKV weight / bias
                    w_o_spec, vec_spec,      # output projection weight / bias
                    vec_spec, vec_spec,      # gamma, beta
                ],
                out_specs=pl.BlockSpec((bt, S, H), lambda b: (b, 0, 0)),
                scratch_shapes=[pltpu.VMEM((bt * S, H), cdt)],
            ),
            compiler_params=pltpu.CompilerParams(
                dimension_semantics=("parallel",),   # shardable across v7x's 2 TCs
                vmem_limit_bytes=int(vmem_limit),
            ),
            cost_estimate=cost,
        )

    args = (x, attention_mask, wqkv, bqkv, wo, params["bo"],
            params["gamma"], params["beta"])
    try:
        return jax.block_until_ready(build(pl.Buffered(1))(*args))
    except Exception:
        # Fallback: run with default (double) buffering if single-buffered
        # invariant operands are rejected by this Pallas version.
        return jax.block_until_ready(build(None)(*args))


def init_params(key, hidden_size):
    H = hidden_size
    keys = jax.random.split(key, 8)
    scale = 0.02

    def lin(kw, kb):
        w = scale * jax.random.normal(kw, (H, H), jnp.float32)   # [out, in]
        b = scale * jax.random.normal(kb, (1, H), jnp.float32)
        return w, b

    wq, bq = lin(keys[0], keys[1])
    wk, bk = lin(keys[2], keys[3])
    wv, bv = lin(keys[4], keys[5])
    wo, bo = lin(keys[6], keys[7])
    return {
        "wq": wq, "bq": bq,
        "wk": wk, "bk": bk,
        "wv": wv, "bv": bv,
        "wo": wo, "bo": bo,
        "gamma": jnp.ones((1, H), jnp.float32),
        "beta": jnp.zeros((1, H), jnp.float32),
    }


def reference_jax(x, attention_mask, params, *, num_heads):
    """Pure-JAX reference mirroring the PyTorch module (dropout=identity)."""
    B, S, H = x.shape
    d = H // num_heads

    def linear(z, w, b):
        return jnp.einsum("bsh,oh->bso", z, w) + b[0]

    q = linear(x, params["wq"], params["bq"]).reshape(B, S, num_heads, d).transpose(0, 2, 1, 3)
    k = linear(x, params["wk"], params["bk"]).reshape(B, S, num_heads, d).transpose(0, 2, 1, 3)
    v = linear(x, params["wv"], params["bv"]).reshape(B, S, num_heads, d).transpose(0, 2, 1, 3)

    scores = jnp.einsum("bnqd,bnkd->bnqk", q, k) / math.sqrt(d)
    scores = scores + attention_mask            # (B,1,1,S) broadcast
    probs = jax.nn.softmax(scores, axis=-1)
    ctx = jnp.einsum("bnqk,bnkd->bnqd", probs, v)
    ctx = ctx.transpose(0, 2, 1, 3).reshape(B, S, H)

    hidden = linear(ctx, params["wo"], params["bo"]) + x
    mu = hidden.mean(-1, keepdims=True)
    var = ((hidden - mu) ** 2).mean(-1, keepdims=True)
    return (hidden - mu) / jnp.sqrt(var + 1e-12) * params["gamma"][0] + params["beta"][0]


if __name__ == "__main__":
    # opt: hidden_size=32, num_attention_heads=4, dropout probs = 0.0
    B, S, H, NH = 2, 8, 32, 4

    key = jax.random.PRNGKey(0)
    kx, km, kp = jax.random.split(key, 3)

    x = jax.random.normal(kx, (B, S, H), jnp.float32)
    # additive attention mask: 0 for visible, -10000 for masked positions
    mask_bits = (jax.random.uniform(km, (B, 1, 1, S)) > 0.2).astype(jnp.float32)
    attention_mask = (1.0 - mask_bits) * -10000.0

    params = init_params(kp, H)
    ref = reference_jax(x, attention_mask, params, num_heads=NH)

    # exact path (f32 MXU inputs, f32 exp) -> tight check against the reference
    out_f32 = bert_selfatt_layer(x, attention_mask, params, num_heads=NH,
                                 compute_dtype=jnp.float32)
    out_f32 = jax.block_until_ready(out_f32)
    assert out_f32.shape == (B, S, H)
    assert jnp.allclose(out_f32, ref, atol=1e-4, rtol=1e-4), "f32 mismatch vs JAX reference"

    # production path (bf16 MXU inputs, f32 accumulation / softmax-sum / LayerNorm)
    out_bf16 = bert_selfatt_layer(x, attention_mask, params, num_heads=NH,
                                  compute_dtype=jnp.bfloat16)
    out_bf16 = jax.block_until_ready(out_bf16)
    assert out_bf16.shape == (B, S, H)
    assert jnp.allclose(out_bf16, ref, atol=2e-2, rtol=2e-2), "bf16 mismatch vs JAX reference"

    print("KERNEL_OK")
</pallas_src>

<mosaic_0001>
module attributes {stable_mosaic.version = 11 : i64} {
  func.func @bert_selfatt_kernel(%arg0: i32, %arg1: memref<1x8x32xf32, #tpu.memory_space<vmem>>, %arg2: memref<1x1x1x8xf32, #tpu.memory_space<vmem>>, %arg3: memref<32x96xf32, #tpu.memory_space<vmem>>, %arg4: memref<1x96xf32, #tpu.memory_space<vmem>>, %arg5: memref<32x32xf32, #tpu.memory_space<vmem>>, %arg6: memref<1x32xf32, #tpu.memory_space<vmem>>, %arg7: memref<1x32xf32, #tpu.memory_space<vmem>>, %arg8: memref<1x32xf32, #tpu.memory_space<vmem>>, %arg9: memref<1x8x32xf32, #tpu.memory_space<vmem>>, %arg10: memref<8x32xf32, #tpu.memory_space<vmem>>) attributes {dimension_semantics = [#tpu.dimension_semantics<parallel>], iteration_bounds = array<i64: 2>, scalar_prefetch = 0 : i64, scratch_operands = 1 : i64, tpu.core_type = #tpu.core_type<tc>, window_params = [{transform_indices = @transform_0, window_bounds = array<i64: 1, 8, 32>}, {transform_indices = @transform_1, window_bounds = array<i64: 1, 1, 1, 8>}, {pipeline_mode = #tpu.pipeline_mode<synchronous>, transform_indices = @transform_2, window_bounds = array<i64: 32, 96>}, {pipeline_mode = #tpu.pipeline_mode<synchronous>, transform_indices = @transform_3, window_bounds = array<i64: 1, 96>}, {pipeline_mode = #tpu.pipeline_mode<synchronous>, transform_indices = @transform_4, window_bounds = array<i64: 32, 32>}, {pipeline_mode = #tpu.pipeline_mode<synchronous>, transform_indices = @transform_5, window_bounds = array<i64: 1, 32>}, {pipeline_mode = #tpu.pipeline_mode<synchronous>, transform_indices = @transform_6, window_bounds = array<i64: 1, 32>}, {pipeline_mode = #tpu.pipeline_mode<synchronous>, transform_indices = @transform_7, window_bounds = array<i64: 1, 32>}, {transform_indices = @transform_8, window_bounds = array<i64: 1, 8, 32>}]} {
    %c0 = arith.constant 0 : index
    %c0_0 = arith.constant 0 : index
    %c0_1 = arith.constant 0 : index
    %0 = vector.load %arg1[%c0, %c0_0, %c0_1] : memref<1x8x32xf32, #tpu.memory_space<vmem>>, vector<1x8x32xf32>
    %1 = vector.shape_cast %0 : vector<1x8x32xf32> to vector<8x32xf32>
    %c0_2 = arith.constant 0 : index
    %c0_3 = arith.constant 0 : index
    %2 = vector.load %arg3[%c0_2, %c0_3] : memref<32x96xf32, #tpu.memory_space<vmem>>, vector<32x96xf32>
    %cst = arith.constant dense<0.000000e+00> : vector<8x96xf32>
    %3 = tpu.matmul %1, %2, %cst {dimension_numbers = #tpu.dot_dimension_numbers<[1], [0], [0], [1], [0, 0, 1, 1], [], []>} : vector<8x32xf32>, vector<32x96xf32>, vector<8x96xf32> -> vector<8x96xf32>
    %c0_4 = arith.constant 0 : index
    %c0_5 = arith.constant 0 : index
    %4 = vector.load %arg4[%c0_4, %c0_5] : memref<1x96xf32, #tpu.memory_space<vmem>>, vector<1x96xf32>
    %5 = vector.broadcast %4 : vector<1x96xf32> to vector<8x96xf32>
    %6 = arith.addf %3, %5 : vector<8x96xf32>
    %7 = vector.extract_strided_slice %6 {offsets = [0, 0], sizes = [8, 32], strides = [1, 1]} : vector<8x96xf32> to vector<8x32xf32>
    %8 = vector.shape_cast %7 : vector<8x32xf32> to vector<1x8x32xf32>
    %9 = vector.extract_strided_slice %6 {offsets = [0, 32], sizes = [8, 32], strides = [1, 1]} : vector<8x96xf32> to vector<8x32xf32>
    %10 = vector.shape_cast %9 : vector<8x32xf32> to vector<1x8x32xf32>
    %11 = vector.extract_strided_slice %6 {offsets = [0, 64], sizes = [8, 32], strides = [1, 1]} : vector<8x96xf32> to vector<8x32xf32>
    %12 = vector.shape_cast %11 : vector<8x32xf32> to vector<1x8x32xf32>
    %c0_6 = arith.constant 0 : index
    %c0_7 = arith.constant 0 : index
    %c0_8 = arith.constant 0 : index
    %c0_9 = arith.constant 0 : index
    %13 = vector.load %arg2[%c0_6, %c0_7, %c0_8, %c0_9] : memref<1x1x1x8xf32, #tpu.memory_space<vmem>>, vector<1x1x1x8xf32>
    %14 = vector.shape_cast %13 : vector<1x1x1x8xf32> to vector<1x1x8xf32>
    %15 = vector.shape_cast %14 : vector<1x1x8xf32> to vector<1x1x8xf32>
    %16 = vector.broadcast %15 : vector<1x1x8xf32> to vector<1x8x8xf32>
    %17 = vector.extract_strided_slice %8 {offsets = [0, 0, 0], sizes = [1, 8, 8], strides = [1, 1, 1]} : vector<1x8x32xf32> to vector<1x8x8xf32>
    %18 = vector.extract_strided_slice %10 {offsets = [0, 0, 0], sizes = [1, 8, 8], strides = [1, 1, 1]} : vector<1x8x32xf32> to vector<1x8x8xf32>
    %19 = vector.extract_strided_slice %12 {offsets = [0, 0, 0], sizes = [1, 8, 8], strides = [1, 1, 1]} : vector<1x8x32xf32> to vector<1x8x8xf32>
    "tpu.trace_start"() <{level = 10 : i32, message = "bqd,bkd->bqk"}> : () -> ()
    %cst_10 = arith.constant dense<0.000000e+00> : vector<1x8x8xf32>
    %20 = tpu.matmul %17, %18, %cst_10 {dimension_numbers = #tpu.dot_dimension_numbers<[2], [2], [1], [1], [0, 0, 0, 1, 1, 1], [0], [0]>} : vector<1x8x8xf32>, vector<1x8x8xf32>, vector<1x8x8xf32> -> vector<1x8x8xf32>
    "tpu.trace_stop"() : () -> ()
    %21 = arith.addf %20, %16 : vector<1x8x8xf32>
    %cst_11 = arith.constant dense<0xFF800000> : vector<1x8xf32>
    %22 = vector.multi_reduction <maximumf>, %21, %cst_11 [2] : vector<1x8x8xf32> to vector<1x8xf32>
    %23 = vector.shape_cast %22 : vector<1x8xf32> to vector<1x8x1xf32>
    %24 = vector.broadcast %23 : vector<1x8x1xf32> to vector<1x8x8xf32>
    %25 = arith.subf %21, %24 : vector<1x8x8xf32>
    %26 = math.exp %25 : vector<1x8x8xf32>
    %cst_12 = arith.constant dense<0.000000e+00> : vector<1x8xf32>
    %27 = vector.multi_reduction <add>, %26, %cst_12 [2] : vector<1x8x8xf32> to vector<1x8xf32>
    %28 = vector.shape_cast %27 : vector<1x8xf32> to vector<1x8x1xf32>
    %29 = tpu.reciprocal %28 : vector<1x8x1xf32> -> vector<1x8x1xf32>
    %30 = vector.broadcast %29 : vector<1x8x1xf32> to vector<1x8x8xf32>
    %31 = arith.mulf %26, %30 : vector<1x8x8xf32>
    "tpu.trace_start"() <{level = 10 : i32, message = "bqk,bkd->bqd"}> : () -> ()
    %cst_13 = arith.constant dense<0.000000e+00> : vector<1x8x8xf32>
    %32 = tpu.matmul %31, %19, %cst_13 {dimension_numbers = #tpu.dot_dimension_numbers<[2], [1], [1], [2], [0, 0, 0, 1, 1, 2], [0], [0]>} : vector<1x8x8xf32>, vector<1x8x8xf32>, vector<1x8x8xf32> -> vector<1x8x8xf32>
    "tpu.trace_stop"() : () -> ()
    %33 = vector.shape_cast %32 : vector<1x8x8xf32> to vector<8x8xf32>
    %c0_14 = arith.constant 0 : index
    %c0_15 = arith.constant 0 : index
    %34 = vector.load %arg10[%c0_14, %c0_15] : memref<8x32xf32, #tpu.memory_space<vmem>>, vector<8x8xf32>
    tpu.vector_store %arg10[%c0_14, %c0_15], %33 {strides = array<i32>} : memref<8x32xf32, #tpu.memory_space<vmem>>, vector<8x8xf32>,
    %35 = vector.extract_strided_slice %8 {offsets = [0, 0, 8], sizes = [1, 8, 8], strides = [1, 1, 1]} : vector<1x8x32xf32> to vector<1x8x8xf32>
    %36 = vector.extract_strided_slice %10 {offsets = [0, 0, 8], sizes = [1, 8, 8], strides = [1, 1, 1]} : vector<1x8x32xf32> to vector<1x8x8xf32>
    %37 = vector.extract_strided_slice %12 {offsets = [0, 0, 8], sizes = [1, 8, 8], strides = [1, 1, 1]} : vector<1x8x32xf32> to vector<1x8x8xf32>
    "tpu.trace_start"() <{level = 10 : i32, message = "bqd,bkd->bqk"}> : () -> ()
    %cst_16 = arith.constant dense<0.000000e+00> : vector<1x8x8xf32>
    %38 = tpu.matmul %35, %36, %cst_16 {dimension_numbers = #tpu.dot_dimension_numbers<[2], [2], [1], [1], [0, 0, 0, 1, 1, 1], [0], [0]>} : vector<1x8x8xf32>, vector<1x8x8xf32>, vector<1x8x8xf32> -> vector<1x8x8xf32>
    "tpu.trace_stop"() : () -> ()
    %39 = arith.addf %38, %16 : vector<1x8x8xf32>
    %cst_17 = arith.constant dense<0xFF800000> : vector<1x8xf32>
    %40 = vector.multi_reduction <maximumf>, %39, %cst_17 [2] : vector<1x8x8xf32> to vector<1x8xf32>
    %41 = vector.shape_cast %40 : vector<1x8xf32> to vector<1x8x1xf32>
    %42 = vector.broadcast %41 : vector<1x8x1xf32> to vector<1x8x8xf32>
    %43 = arith.subf %39, %42 : vector<1x8x8xf32>
    %44 = math.exp %43 : vector<1x8x8xf32>
    %cst_18 = arith.constant dense<0.000000e+00> : vector<1x8xf32>
    %45 = vector.multi_reduction <add>, %44, %cst_18 [2] : vector<1x8x8xf32> to vector<1x8xf32>
    %46 = vector.shape_cast %45 : vector<1x8xf32> to vector<1x8x1xf32>
    %47 = tpu.reciprocal %46 : vector<1x8x1xf32> -> vector<1x8x1xf32>
    %48 = vector.broadcast %47 : vector<1x8x1xf32> to vector<1x8x8xf32>
    %49 = arith.mulf %44, %48 : vector<1x8x8xf32>
    "tpu.trace_start"() <{level = 10 : i32, message = "bqk,bkd->bqd"}> : () -> ()
    %cst_19 = arith.constant dense<0.000000e+00> : vector<1x8x8xf32>
    %50 = tpu.matmul %49, %37, %cst_19 {dimension_numbers = #tpu.dot_dimension_numbers<[2], [1], [1], [2], [0, 0, 0, 1, 1, 2], [0], [0]>} : vector<1x8x8xf32>, vector<1x8x8xf32>, vector<1x8x8xf32> -> vector<1x8x8xf32>
    "tpu.trace_stop"() : () -> ()
    %51 = vector.shape_cast %50 : vector<1x8x8xf32> to vector<8x8xf32>
    %c0_20 = arith.constant 0 : index
    %c8 = arith.constant 8 : index
    %52 = vector.load %arg10[%c0_20, %c8] : memref<8x32xf32, #tpu.memory_space<vmem>>, vector<8x8xf32>
    tpu.vector_store %arg10[%c0_20, %c8], %51 {strides = array<i32>} : memref<8x32xf32, #tpu.memory_space<vmem>>, vector<8x8xf32>,
    %53 = vector.extract_strided_slice %8 {offsets = [0, 0, 16], sizes = [1, 8, 8], strides = [1, 1, 1]} : vector<1x8x32xf32> to vector<1x8x8xf32>
    %54 = vector.extract_strided_slice %10 {offsets = [0, 0, 16], sizes = [1, 8, 8], strides = [1, 1, 1]} : vector<1x8x32xf32> to vector<1x8x8xf32>
    %55 = vector.extract_strided_slice %12 {offsets = [0, 0, 16], sizes = [1, 8, 8], strides = [1, 1, 1]} : vector<1x8x32xf32> to vector<1x8x8xf32>
    "tpu.trace_start"() <{level = 10 : i32, message = "bqd,bkd->bqk"}> : () -> ()
    %cst_21 = arith.constant dense<0.000000e+00> : vector<1x8x8xf32>
    %56 = tpu.matmul %53, %54, %cst_21 {dimension_numbers = #tpu.dot_dimension_numbers<[2], [2], [1], [1], [0, 0, 0, 1, 1, 1], [0], [0]>} : vector<1x8x8xf32>, vector<1x8x8xf32>, vector<1x8x8xf32> -> vector<1x8x8xf32>
    "tpu.trace_stop"() : () -> ()
    %57 = arith.addf %56, %16 : vector<1x8x8xf32>
    %cst_22 = arith.constant dense<0xFF800000> : vector<1x8xf32>
    %58 = vector.multi_reduction <maximumf>, %57, %cst_22 [2] : vector<1x8x8xf32> to vector<1x8xf32>
    %59 = vector.shape_cast %58 : vector<1x8xf32> to vector<1x8x1xf32>
    %60 = vector.broadcast %59 : vector<1x8x1xf32> to vector<1x8x8xf32>
    %61 = arith.subf %57, %60 : vector<1x8x8xf32>
    %62 = math.exp %61 : vector<1x8x8xf32>
    %cst_23 = arith.constant dense<0.000000e+00> : vector<1x8xf32>
    %63 = vector.multi_reduction <add>, %62, %cst_23 [2] : vector<1x8x8xf32> to vector<1x8xf32>
    %64 = vector.shape_cast %63 : vector<1x8xf32> to vector<1x8x1xf32>
    %65 = tpu.reciprocal %64 : vector<1x8x1xf32> -> vector<1x8x1xf32>
    %66 = vector.broadcast %65 : vector<1x8x1xf32> to vector<1x8x8xf32>
    %67 = arith.mulf %62, %66 : vector<1x8x8xf32>
    "tpu.trace_start"() <{level = 10 : i32, message = "bqk,bkd->bqd"}> : () -> ()
    %cst_24 = arith.constant dense<0.000000e+00> : vector<1x8x8xf32>
    %68 = tpu.matmul %67, %55, %cst_24 {dimension_numbers = #tpu.dot_dimension_numbers<[2], [1], [1], [2], [0, 0, 0, 1, 1, 2], [0], [0]>} : vector<1x8x8xf32>, vector<1x8x8xf32>, vector<1x8x8xf32> -> vector<1x8x8xf32>
    "tpu.trace_stop"() : () -> ()
    %69 = vector.shape_cast %68 : vector<1x8x8xf32> to vector<8x8xf32>
    %c0_25 = arith.constant 0 : index
    %c16 = arith.constant 16 : index
    %70 = vector.load %arg10[%c0_25, %c16] : memref<8x32xf32, #tpu.memory_space<vmem>>, vector<8x8xf32>
    tpu.vector_store %arg10[%c0_25, %c16], %69 {strides = array<i32>} : memref<8x32xf32, #tpu.memory_space<vmem>>, vector<8x8xf32>,
    %71 = vector.extract_strided_slice %8 {offsets = [0, 0, 24], sizes = [1, 8, 8], strides = [1, 1, 1]} : vector<1x8x32xf32> to vector<1x8x8xf32>
    %72 = vector.extract_strided_slice %10 {offsets = [0, 0, 24], sizes = [1, 8, 8], strides = [1, 1, 1]} : vector<1x8x32xf32> to vector<1x8x8xf32>
    %73 = vector.extract_strided_slice %12 {offsets = [0, 0, 24], sizes = [1, 8, 8], strides = [1, 1, 1]} : vector<1x8x32xf32> to vector<1x8x8xf32>
    "tpu.trace_start"() <{level = 10 : i32, message = "bqd,bkd->bqk"}> : () -> ()
    %cst_26 = arith.constant dense<0.000000e+00> : vector<1x8x8xf32>
    %74 = tpu.matmul %71, %72, %cst_26 {dimension_numbers = #tpu.dot_dimension_numbers<[2], [2], [1], [1], [0, 0, 0, 1, 1, 1], [0], [0]>} : vector<1x8x8xf32>, vector<1x8x8xf32>, vector<1x8x8xf32> -> vector<1x8x8xf32>
    "tpu.trace_stop"() : () -> ()
    %75 = arith.addf %74, %16 : vector<1x8x8xf32>
    %cst_27 = arith.constant dense<0xFF800000> : vector<1x8xf32>
    %76 = vector.multi_reduction <maximumf>, %75, %cst_27 [2] : vector<1x8x8xf32> to vector<1x8xf32>
    %77 = vector.shape_cast %76 : vector<1x8xf32> to vector<1x8x1xf32>
    %78 = vector.broadcast %77 : vector<1x8x1xf32> to vector<1x8x8xf32>
    %79 = arith.subf %75, %78 : vector<1x8x8xf32>
    %80 = math.exp %79 : vector<1x8x8xf32>
    %cst_28 = arith.constant dense<0.000000e+00> : vector<1x8xf32>
    %81 = vector.multi_reduction <add>, %80, %cst_28 [2] : vector<1x8x8xf32> to vector<1x8xf32>
    %82 = vector.shape_cast %81 : vector<1x8xf32> to vector<1x8x1xf32>
    %83 = tpu.reciprocal %82 : vector<1x8x1xf32> -> vector<1x8x1xf32>
    %84 = vector.broadcast %83 : vector<1x8x1xf32> to vector<1x8x8xf32>
    %85 = arith.mulf %80, %84 : vector<1x8x8xf32>
    "tpu.trace_start"() <{level = 10 : i32, message = "bqk,bkd->bqd"}> : () -> ()
    %cst_29 = arith.constant dense<0.000000e+00> : vector<1x8x8xf32>
    %86 = tpu.matmul %85, %73, %cst_29 {dimension_numbers = #tpu.dot_dimension_numbers<[2], [1], [1], [2], [0, 0, 0, 1, 1, 2], [0], [0]>} : vector<1x8x8xf32>, vector<1x8x8xf32>, vector<1x8x8xf32> -> vector<1x8x8xf32>
    "tpu.trace_stop"() : () -> ()
    %87 = vector.shape_cast %86 : vector<1x8x8xf32> to vector<8x8xf32>
    %c0_30 = arith.constant 0 : index
    %c24 = arith.constant 24 : index
    %88 = vector.load %arg10[%c0_30, %c24] : memref<8x32xf32, #tpu.memory_space<vmem>>, vector<8x8xf32>
    tpu.vector_store %arg10[%c0_30, %c24], %87 {strides = array<i32>} : memref<8x32xf32, #tpu.memory_space<vmem>>, vector<8x8xf32>,
    %c0_31 = arith.constant 0 : index
    %c0_32 = arith.constant 0 : index
    %89 = vector.load %arg6[%c0_31, %c0_32] : memref<1x32xf32, #tpu.memory_space<vmem>>, vector<1x32xf32>
    %90 = vector.broadcast %89 : vector<1x32xf32> to vector<8x32xf32>
    %91 = arith.addf %1, %90 : vector<8x32xf32>
    %c0_33 = arith.constant 0 : index
    %c0_34 = arith.constant 0 : index
    %92 = vector.load %arg10[%c0_33, %c0_34] : memref<8x32xf32, #tpu.memory_space<vmem>>, vector<8x32xf32>
    %c0_35 = arith.constant 0 : index
    %c0_36 = arith.constant 0 : index
    %93 = vector.load %arg5[%c0_35, %c0_36] : memref<32x32xf32, #tpu.memory_space<vmem>>, vector<32x32xf32>
    %cst_37 = arith.constant dense<0.000000e+00> : vector<8x32xf32>
    %94 = tpu.matmul %92, %93, %cst_37 {dimension_numbers = #tpu.dot_dimension_numbers<[1], [0], [0], [1], [0, 0, 1, 1], [], []>} : vector<8x32xf32>, vector<32x32xf32>, vector<8x32xf32> -> vector<8x32xf32>
    %95 = arith.addf %91, %94 : vector<8x32xf32>
    %cst_38 = arith.constant dense<0.000000e+00> : vector<8xf32>
    %96 = vector.multi_reduction <add>, %95, %cst_38 [1] : vector<8x32xf32> to vector<8xf32>
    %97 = vector.shape_cast %96 : vector<8xf32> to vector<8x1xf32>
    %cst_39 = arith.constant 3.200000e+01 : f32
    %98 = vector.broadcast %cst_39 : f32 to vector<8x1xf32>
    %99 = arith.divf %97, %98 : vector<8x1xf32>
    %100 = vector.broadcast %99 : vector<8x1xf32> to vector<8x32xf32>
    %101 = arith.subf %95, %100 : vector<8x32xf32>
    %102 = arith.mulf %101, %101 : vector<8x32xf32>
    %cst_40 = arith.constant dense<0.000000e+00> : vector<8xf32>
    %103 = vector.multi_reduction <add>, %102, %cst_40 [1] : vector<8x32xf32> to vector<8xf32>
    %104 = vector.shape_cast %103 : vector<8xf32> to vector<8x1xf32>
    %cst_41 = arith.constant 3.200000e+01 : f32
    %105 = vector.broadcast %cst_41 : f32 to vector<8x1xf32>
    %106 = arith.divf %104, %105 : vector<8x1xf32>
    %cst_42 = arith.constant 9.99999996E-13 : f32
    %107 = vector.broadcast %cst_42 : f32 to vector<8x1xf32>
    %108 = arith.addf %106, %107 : vector<8x1xf32>
    %109 = math.rsqrt %108 : vector<8x1xf32>
    %110 = vector.broadcast %109 : vector<8x1xf32> to vector<8x32xf32>
    %111 = arith.mulf %101, %110 : vector<8x32xf32>
    %c0_43 = arith.constant 0 : index
    %c0_44 = arith.constant 0 : index
    %112 = vector.load %arg7[%c0_43, %c0_44] : memref<1x32xf32, #tpu.memory_space<vmem>>, vector<1x32xf32>
    %113 = vector.broadcast %112 : vector<1x32xf32> to vector<8x32xf32>
    %114 = arith.mulf %111, %113 : vector<8x32xf32>
    %c0_45 = arith.constant 0 : index
    %c0_46 = arith.constant 0 : index
    %115 = vector.load %arg8[%c0_45, %c0_46] : memref<1x32xf32, #tpu.memory_space<vmem>>, vector<1x32xf32>
    %116 = vector.broadcast %115 : vector<1x32xf32> to vector<8x32xf32>
    %117 = arith.addf %114, %116 : vector<8x32xf32>
    %118 = vector.shape_cast %117 : vector<8x32xf32> to vector<1x8x32xf32>
    %c0_47 = arith.constant 0 : index
    %c0_48 = arith.constant 0 : index
    %c0_49 = arith.constant 0 : index
    %119 = vector.load %arg9[%c0_47, %c0_48, %c0_49] : memref<1x8x32xf32, #tpu.memory_space<vmem>>, vector<1x8x32xf32>
    tpu.vector_store %arg9[%c0_47, %c0_48, %c0_49], %118 {strides = array<i32>} : memref<1x8x32xf32, #tpu.memory_space<vmem>>, vector<1x8x32xf32>,
    return
  }
  func.func @transform_0(%arg0: i32) -> (i32, i32, i32) {
    %c0_i32 = arith.constant 0 : i32
    %c0_i32_0 = arith.constant 0 : i32
    %c0_i32_1 = arith.constant 0 : i32
    return %arg0, %c0_i32, %c0_i32_0 : i32, i32, i32
  }
  func.func @transform_1(%arg0: i32) -> (i32, i32, i32, i32) {
    %c0_i32 = arith.constant 0 : i32
    %c0_i32_0 = arith.constant 0 : i32
    %c0_i32_1 = arith.constant 0 : i32
    %c0_i32_2 = arith.constant 0 : i32
    return %arg0, %c0_i32, %c0_i32_0, %c0_i32_1 : i32, i32, i32, i32
  }
  func.func @transform_2(%arg0: i32) -> (i32, i32) {
    %c0_i32 = arith.constant 0 : i32
    %c0_i32_0 = arith.constant 0 : i32
    %c0_i32_1 = arith.constant 0 : i32
    return %c0_i32, %c0_i32_0 : i32, i32
  }
  func.func @transform_3(%arg0: i32) -> (i32, i32) {
    %c0_i32 = arith.constant 0 : i32
    %c0_i32_0 = arith.constant 0 : i32
    %c0_i32_1 = arith.constant 0 : i32
    return %c0_i32, %c0_i32_0 : i32, i32
  }
  func.func @transform_4(%arg0: i32) -> (i32, i32) {
    %c0_i32 = arith.constant 0 : i32
    %c0_i32_0 = arith.constant 0 : i32
    %c0_i32_1 = arith.constant 0 : i32
    return %c0_i32, %c0_i32_0 : i32, i32
  }
  func.func @transform_5(%arg0: i32) -> (i32, i32) {
    %c0_i32 = arith.constant 0 : i32
    %c0_i32_0 = arith.constant 0 : i32
    %c0_i32_1 = arith.constant 0 : i32
    return %c0_i32, %c0_i32_0 : i32, i32
  }
  func.func @transform_6(%arg0: i32) -> (i32, i32) {
    %c0_i32 = arith.constant 0 : i32
    %c0_i32_0 = arith.constant 0 : i32
    %c0_i32_1 = arith.constant 0 : i32
    return %c0_i32, %c0_i32_0 : i32, i32
  }
  func.func @transform_7(%arg0: i32) -> (i32, i32) {
    %c0_i32 = arith.constant 0 : i32
    %c0_i32_0 = arith.constant 0 : i32
    %c0_i32_1 = arith.constant 0 : i32
    return %c0_i32, %c0_i32_0 : i32, i32
  }
  func.func @transform_8(%arg0: i32) -> (i32, i32, i32) {
    %c0_i32 = arith.constant 0 : i32
    %c0_i32_0 = arith.constant 0 : i32
    %c0_i32_1 = arith.constant 0 : i32
    return %arg0, %c0_i32, %c0_i32_0 : i32, i32, i32
  }
}

module attributes {stable_mosaic.version = 11 : i64} {
  func.func @bert_selfatt_kernel(%arg0: i32, %arg1: memref<1x8x32xf32, #tpu.memory_space<vmem>>, %arg2: memref<1x1x1x8xf32, #tpu.memory_space<vmem>>, %arg3: memref<32x96xf32, #tpu.memory_space<vmem>>, %arg4: memref<1x96xf32, #tpu.memory_space<vmem>>, %arg5: memref<32x32xf32, #tpu.memory_space<vmem>>, %arg6: memref<1x32xf32, #tpu.memory_space<vmem>>, %arg7: memref<1x32xf32, #tpu.memory_space<vmem>>, %arg8: memref<1x32xf32, #tpu.memory_space<vmem>>, %arg9: memref<1x8x32xf32, #tpu.memory_space<vmem>>, %arg10: memref<8x32xf32, #tpu.memory_space<vmem>>) attributes {dimension_semantics = [#tpu.dimension_semantics<parallel>], iteration_bounds = array<i64: 2>, scalar_prefetch = 0 : i64, scratch_operands = 1 : i64, tpu.core_type = #tpu.core_type<tc>, window_params = [{transform_indices = @transform_0, window_bounds = array<i64: 1, 8, 32>}, {transform_indices = @transform_1, window_bounds = array<i64: 1, 1, 1, 8>}, {pipeline_mode = #tpu.pipeline_mode<synchronous>, transform_indices = @transform_2, window_bounds = array<i64: 32, 96>}, {pipeline_mode = #tpu.pipeline_mode<synchronous>, transform_indices = @transform_3, window_bounds = array<i64: 1, 96>}, {pipeline_mode = #tpu.pipeline_mode<synchronous>, transform_indices = @transform_4, window_bounds = array<i64: 32, 32>}, {pipeline_mode = #tpu.pipeline_mode<synchronous>, transform_indices = @transform_5, window_bounds = array<i64: 1, 32>}, {pipeline_mode = #tpu.pipeline_mode<synchronous>, transform_indices = @transform_6, window_bounds = array<i64: 1, 32>}, {pipeline_mode = #tpu.pipeline_mode<synchronous>, transform_indices = @transform_7, window_bounds = array<i64: 1, 32>}, {transform_indices = @transform_8, window_bounds = array<i64: 1, 8, 32>}]} {
    %c0 = arith.constant 0 : index
    %c0_0 = arith.constant 0 : index
    %c0_1 = arith.constant 0 : index
    %0 = vector.load %arg1[%c0, %c0_0, %c0_1] : memref<1x8x32xf32, #tpu.memory_space<vmem>>, vector<1x8x32xf32>
    %1 = vector.shape_cast %0 : vector<1x8x32xf32> to vector<8x32xf32>
    %c0_2 = arith.constant 0 : index
    %c0_3 = arith.constant 0 : index
    %2 = vector.load %arg3[%c0_2, %c0_3] : memref<32x96xf32, #tpu.memory_space<vmem>>, vector<32x96xf32>
    %cst = arith.constant dense<0.000000e+00> : vector<8x96xf32>
    %3 = tpu.matmul %1, %2, %cst {dimension_numbers = #tpu.dot_dimension_numbers<[1], [0], [0], [1], [0, 0, 1, 1], [], []>} : vector<8x32xf32>, vector<32x96xf32>, vector<8x96xf32> -> vector<8x96xf32>
    %c0_4 = arith.constant 0 : index
    %c0_5 = arith.constant 0 : index
    %4 = vector.load %arg4[%c0_4, %c0_5] : memref<1x96xf32, #tpu.memory_space<vmem>>, vector<1x96xf32>
    %5 = vector.broadcast %4 : vector<1x96xf32> to vector<8x96xf32>
    %6 = arith.addf %3, %5 : vector<8x96xf32>
    %7 = vector.extract_strided_slice %6 {offsets = [0, 0], sizes = [8, 32], strides = [1, 1]} : vector<8x96xf32> to vector<8x32xf32>
    %8 = vector.shape_cast %7 : vector<8x32xf32> to vector<1x8x32xf32>
    %9 = vector.extract_strided_slice %6 {offsets = [0, 32], sizes = [8, 32], strides = [1, 1]} : vector<8x96xf32> to vector<8x32xf32>
    %10 = vector.shape_cast %9 : vector<8x32xf32> to vector<1x8x32xf32>
    %11 = vector.extract_strided_slice %6 {offsets = [0, 64], sizes = [8, 32], strides = [1, 1]} : vector<8x96xf32> to vector<8x32xf32>
    %12 = vector.shape_cast %11 : vector<8x32xf32> to vector<1x8x32xf32>
    %c0_6 = arith.constant 0 : index
    %c0_7 = arith.constant 0 : index
    %c0_8 = arith.constant 0 : index
    %c0_9 = arith.constant 0 : index
    %13 = vector.load %arg2[%c0_6, %c0_7, %c0_8, %c0_9] : memref<1x1x1x8xf32, #tpu.memory_space<vmem>>, vector<1x1x1x8xf32>
    %14 = vector.shape_cast %13 : vector<1x1x1x8xf32> to vector<1x1x8xf32>
    %15 = vector.shape_cast %14 : vector<1x1x8xf32> to vector<1x1x8xf32>
    %16 = vector.broadcast %15 : vector<1x1x8xf32> to vector<1x8x8xf32>
    %17 = vector.extract_strided_slice %8 {offsets = [0, 0, 0], sizes = [1, 8, 8], strides = [1, 1, 1]} : vector<1x8x32xf32> to vector<1x8x8xf32>
    %18 = vector.extract_strided_slice %10 {offsets = [0, 0, 0], sizes = [1, 8, 8], strides = [1, 1, 1]} : vector<1x8x32xf32> to vector<1x8x8xf32>
    %19 = vector.extract_strided_slice %12 {offsets = [0, 0, 0], sizes = [1, 8, 8], strides = [1, 1, 1]} : vector<1x8x32xf32> to vector<1x8x8xf32>
    "tpu.trace_start"() <{level = 10 : i32, message = "bqd,bkd->bqk"}> : () -> ()
    %cst_10 = arith.constant dense<0.000000e+00> : vector<1x8x8xf32>
    %20 = tpu.matmul %17, %18, %cst_10 {dimension_numbers = #tpu.dot_dimension_numbers<[2], [2], [1], [1], [0, 0, 0, 1, 1, 1], [0], [0]>} : vector<1x8x8xf32>, vector<1x8x8xf32>, vector<1x8x8xf32> -> vector<1x8x8xf32>
    "tpu.trace_stop"() : () -> ()
    %21 = arith.addf %20, %16 : vector<1x8x8xf32>
    %cst_11 = arith.constant dense<0xFF800000> : vector<1x8xf32>
    %22 = vector.multi_reduction <maximumf>, %21, %cst_11 [2] : vector<1x8x8xf32> to vector<1x8xf32>
    %23 = vector.shape_cast %22 : vector<1x8xf32> to vector<1x8x1xf32>
    %24 = vector.broadcast %23 : vector<1x8x1xf32> to vector<1x8x8xf32>
    %25 = arith.subf %21, %24 : vector<1x8x8xf32>
    %26 = math.exp %25 : vector<1x8x8xf32>
    %cst_12 = arith.constant dense<0.000000e+00> : vector<1x8xf32>
    %27 = vector.multi_reduction <add>, %26, %cst_12 [2] : vector<1x8x8xf32> to vector<1x8xf32>
    %28 = vector.shape_cast %27 : vector<1x8xf32> to vector<1x8x1xf32>
    %29 = tpu.reciprocal %28 : vector<1x8x1xf32> -> vector<1x8x1xf32>
    %30 = vector.broadcast %29 : vector<1x8x1xf32> to vector<1x8x8xf32>
    %31 = arith.mulf %26, %30 : vector<1x8x8xf32>
    "tpu.trace_start"() <{level = 10 : i32, message = "bqk,bkd->bqd"}> : () -> ()
    %cst_13 = arith.constant dense<0.000000e+00> : vector<1x8x8xf32>
    %32 = tpu.matmul %31, %19, %cst_13 {dimension_numbers = #tpu.dot_dimension_numbers<[2], [1], [1], [2], [0, 0, 0, 1, 1, 2], [0], [0]>} : vector<1x8x8xf32>, vector<1x8x8xf32>, vector<1x8x8xf32> -> vector<1x8x8xf32>
    "tpu.trace_stop"() : () -> ()
    %33 = vector.shape_cast %32 : vector<1x8x8xf32> to vector<8x8xf32>
    %c0_14 = arith.constant 0 : index
    %c0_15 = arith.constant 0 : index
    %34 = vector.load %arg10[%c0_14, %c0_15] : memref<8x32xf32, #tpu.memory_space<vmem>>, vector<8x8xf32>
    tpu.vector_store %arg10[%c0_14, %c0_15], %33 {strides = array<i32>} : memref<8x32xf32, #tpu.memory_space<vmem>>, vector<8x8xf32>,
    %35 = vector.extract_strided_slice %8 {offsets = [0, 0, 8], sizes = [1, 8, 8], strides = [1, 1, 1]} : vector<1x8x32xf32> to vector<1x8x8xf32>
    %36 = vector.extract_strided_slice %10 {offsets = [0, 0, 8], sizes = [1, 8, 8], strides = [1, 1, 1]} : vector<1x8x32xf32> to vector<1x8x8xf32>
    %37 = vector.extract_strided_slice %12 {offsets = [0, 0, 8], sizes = [1, 8, 8], strides = [1, 1, 1]} : vector<1x8x32xf32> to vector<1x8x8xf32>
    "tpu.trace_start"() <{level = 10 : i32, message = "bqd,bkd->bqk"}> : () -> ()
    %cst_16 = arith.constant dense<0.000000e+00> : vector<1x8x8xf32>
    %38 = tpu.matmul %35, %36, %cst_16 {dimension_numbers = #tpu.dot_dimension_numbers<[2], [2], [1], [1], [0, 0, 0, 1, 1, 1], [0], [0]>} : vector<1x8x8xf32>, vector<1x8x8xf32>, vector<1x8x8xf32> -> vector<1x8x8xf32>
    "tpu.trace_stop"() : () -> ()
    %39 = arith.addf %38, %16 : vector<1x8x8xf32>
    %cst_17 = arith.constant dense<0xFF800000> : vector<1x8xf32>
    %40 = vector.multi_reduction <maximumf>, %39, %cst_17 [2] : vector<1x8x8xf32> to vector<1x8xf32>
    %41 = vector.shape_cast %40 : vector<1x8xf32> to vector<1x8x1xf32>
    %42 = vector.broadcast %41 : vector<1x8x1xf32> to vector<1x8x8xf32>
    %43 = arith.subf %39, %42 : vector<1x8x8xf32>
    %44 = math.exp %43 : vector<1x8x8xf32>
    %cst_18 = arith.constant dense<0.000000e+00> : vector<1x8xf32>
    %45 = vector.multi_reduction <add>, %44, %cst_18 [2] : vector<1x8x8xf32> to vector<1x8xf32>
    %46 = vector.shape_cast %45 : vector<1x8xf32> to vector<1x8x1xf32>
    %47 = tpu.reciprocal %46 : vector<1x8x1xf32> -> vector<1x8x1xf32>
    %48 = vector.broadcast %47 : vector<1x8x1xf32> to vector<1x8x8xf32>
    %49 = arith.mulf %44, %48 : vector<1x8x8xf32>
    "tpu.trace_start"() <{level = 10 : i32, message = "bqk,bkd->bqd"}> : () -> ()
    %cst_19 = arith.constant dense<0.000000e+00> : vector<1x8x8xf32>
    %50 = tpu.matmul %49, %37, %cst_19 {dimension_numbers = #tpu.dot_dimension_numbers<[2], [1], [1], [2], [0, 0, 0, 1, 1, 2], [0], [0]>} : vector<1x8x8xf32>, vector<1x8x8xf32>, vector<1x8x8xf32> -> vector<1x8x8xf32>
    "tpu.trace_stop"() : () -> ()
    %51 = vector.shape_cast %50 : vector<1x8x8xf32> to vector<8x8xf32>
    %c0_20 = arith.constant 0 : index
    %c8 = arith.constant 8 : index
    %52 = vector.load %arg10[%c0_20, %c8] : memref<8x32xf32, #tpu.memory_space<vmem>>, vector<8x8xf32>
    tpu.vector_store %arg10[%c0_20, %c8], %51 {strides = array<i32>} : memref<8x32xf32, #tpu.memory_space<vmem>>, vector<8x8xf32>,
    %53 = vector.extract_strided_slice %8 {offsets = [0, 0, 16], sizes = [1, 8, 8], strides = [1, 1, 1]} : vector<1x8x32xf32> to vector<1x8x8xf32>
    %54 = vector.extract_strided_slice %10 {offsets = [0, 0, 16], sizes = [1, 8, 8], strides = [1, 1, 1]} : vector<1x8x32xf32> to vector<1x8x8xf32>
    %55 = vector.extract_strided_slice %12 {offsets = [0, 0, 16], sizes = [1, 8, 8], strides = [1, 1, 1]} : vector<1x8x32xf32> to vector<1x8x8xf32>
    "tpu.trace_start"() <{level = 10 : i32, message = "bqd,bkd->bqk"}> : () -> ()
    %cst_21 = arith.constant dense<0.000000e+00> : vector<1x8x8xf32>
    %56 = tpu.matmul %53, %54, %cst_21 {dimension_numbers = #tpu.dot_dimension_numbers<[2], [2], [1], [1], [0, 0, 0, 1, 1, 1], [0], [0]>} : vector<1x8x8xf32>, vector<1x8x8xf32>, vector<1x8x8xf32> -> vector<1x8x8xf32>
    "tpu.trace_stop"() : () -> ()
    %57 = arith.addf %56, %16 : vector<1x8x8xf32>
    %cst_22 = arith.constant dense<0xFF800000> : vector<1x8xf32>
    %58 = vector.multi_reduction <maximumf>, %57, %cst_22 [2] : vector<1x8x8xf32> to vector<1x8xf32>
    %59 = vector.shape_cast %58 : vector<1x8xf32> to vector<1x8x1xf32>
    %60 = vector.broadcast %59 : vector<1x8x1xf32> to vector<1x8x8xf32>
    %61 = arith.subf %57, %60 : vector<1x8x8xf32>
    %62 = math.exp %61 : vector<1x8x8xf32>
    %cst_23 = arith.constant dense<0.000000e+00> : vector<1x8xf32>
    %63 = vector.multi_reduction <add>, %62, %cst_23 [2] : vector<1x8x8xf32> to vector<1x8xf32>
    %64 = vector.shape_cast %63 : vector<1x8xf32> to vector<1x8x1xf32>
    %65 = tpu.reciprocal %64 : vector<1x8x1xf32> -> vector<1x8x1xf32>
    %66 = vector.broadcast %65 : vector<1x8x1xf32> to vector<1x8x8xf32>
    %67 = arith.mulf %62, %66 : vector<1x8x8xf32>
    "tpu.trace_start"() <{level = 10 : i32, message = "bqk,bkd->bqd"}> : () -> ()
    %cst_24 = arith.constant dense<0.000000e+00> : vector<1x8x8xf32>
    %68 = tpu.matmul %67, %55, %cst_24 {dimension_numbers = #tpu.dot_dimension_numbers<[2], [1], [1], [2], [0, 0, 0, 1, 1, 2], [0], [0]>} : vector<1x8x8xf32>, vector<1x8x8xf32>, vector<1x8x8xf32> -> vector<1x8x8xf32>
    "tpu.trace_stop"() : () -> ()
    %69 = vector.shape_cast %68 : vector<1x8x8xf32> to vector<8x8xf32>
    %c0_25 = arith.constant 0 : index
    %c16 = arith.constant 16 : index
    %70 = vector.load %arg10[%c0_25, %c16] : memref<8x32xf32, #tpu.memory_space<vmem>>, vector<8x8xf32>
    tpu.vector_store %arg10[%c0_25, %c16], %69 {strides = array<i32>} : memref<8x32xf32, #tpu.memory_space<vmem>>, vector<8x8xf32>,
    %71 = vector.extract_strided_slice %8 {offsets = [0, 0, 24], sizes = [1, 8, 8], strides = [1, 1, 1]} : vector<1x8x32xf32> to vector<1x8x8xf32>
    %72 = vector.extract_strided_slice %10 {offsets = [0, 0, 24], sizes = [1, 8, 8], strides = [1, 1, 1]} : vector<1x8x32xf32> to vector<1x8x8xf32>
    %73 = vector.extract_strided_slice %12 {offsets = [0, 0, 24], sizes = [1, 8, 8], strides = [1, 1, 1]} : vector<1x8x32xf32> to vector<1x8x8xf32>
    "tpu.trace_start"() <{level = 10 : i32, message = "bqd,bkd->bqk"}> : () -> ()
    %cst_26 = arith.constant dense<0.000000e+00> : vector<1x8x8xf32>
    %74 = tpu.matmul %71, %72, %cst_26 {dimension_numbers = #tpu.dot_dimension_numbers<[2], [2], [1], [1], [0, 0, 0, 1, 1, 1], [0], [0]>} : vector<1x8x8xf32>, vector<1x8x8xf32>, vector<1x8x8xf32> -> vector<1x8x8xf32>
    "tpu.trace_stop"() : () -> ()
    %75 = arith.addf %74, %16 : vector<1x8x8xf32>
    %cst_27 = arith.constant dense<0xFF800000> : vector<1x8xf32>
    %76 = vector.multi_reduction <maximumf>, %75, %cst_27 [2] : vector<1x8x8xf32> to vector<1x8xf32>
    %77 = vector.shape_cast %76 : vector<1x8xf32> to vector<1x8x1xf32>
    %78 = vector.broadcast %77 : vector<1x8x1xf32> to vector<1x8x8xf32>
    %79 = arith.subf %75, %78 : vector<1x8x8xf32>
    %80 = math.exp %79 : vector<1x8x8xf32>
    %cst_28 = arith.constant dense<0.000000e+00> : vector<1x8xf32>
    %81 = vector.multi_reduction <add>, %80, %cst_28 [2] : vector<1x8x8xf32> to vector<1x8xf32>
    %82 = vector.shape_cast %81 : vector<1x8xf32> to vector<1x8x1xf32>
    %83 = tpu.reciprocal %82 : vector<1x8x1xf32> -> vector<1x8x1xf32>
    %84 = vector.broadcast %83 : vector<1x8x1xf32> to vector<1x8x8xf32>
    %85 = arith.mulf %80, %84 : vector<1x8x8xf32>
    "tpu.trace_start"() <{level = 10 : i32, message = "bqk,bkd->bqd"}> : () -> ()
    %cst_29 = arith.constant dense<0.000000e+00> : vector<1x8x8xf32>
    %86 = tpu.matmul %85, %73, %cst_29 {dimension_numbers = #tpu.dot_dimension_numbers<[2], [1], [1], [2], [0, 0, 0, 1, 1, 2], [0], [0]>} : vector<1x8x8xf32>, vector<1x8x8xf32>, vector<1x8x8xf32> -> vector<1x8x8xf32>
    "tpu.trace_stop"() : () -> ()
    %87 = vector.shape_cast %86 : vector<1x8x8xf32> to vector<8x8xf32>
    %c0_30 = arith.constant 0 : index
    %c24 = arith.constant 24 : index
    %88 = vector.load %arg10[%c0_30, %c24] : memref<8x32xf32, #tpu.memory_space<vmem>>, vector<8x8xf32>
    tpu.vector_store %arg10[%c0_30, %c24], %87 {strides = array<i32>} : memref<8x32xf32, #tpu.memory_space<vmem>>, vector<8x8xf32>,
    %c0_31 = arith.constant 0 : index
    %c0_32 = arith.constant 0 : index
    %89 = vector.load %arg6[%c0_31, %c0_32] : memref<1x32xf32, #tpu.memory_space<vmem>>, vector<1x32xf32>
    %90 = vector.broadcast %89 : vector<1x32xf32> to vector<8x32xf32>
    %91 = arith.addf %1, %90 : vector<8x32xf32>
    %c0_33 = arith.constant 0 : index
    %c0_34 = arith.constant 0 : index
    %92 = vector.load %arg10[%c0_33, %c0_34] : memref<8x32xf32, #tpu.memory_space<vmem>>, vector<8x32xf32>
    %c0_35 = arith.constant 0 : index
    %c0_36 = arith.constant 0 : index
    %93 = vector.load %arg5[%c0_35, %c0_36] : memref<32x32xf32, #tpu.memory_space<vmem>>, vector<32x32xf32>
    %cst_37 = arith.constant dense<0.000000e+00> : vector<8x32xf32>
    %94 = tpu.matmul %92, %93, %cst_37 {dimension_numbers = #tpu.dot_dimension_numbers<[1], [0], [0], [1], [0, 0, 1, 1], [], []>} : vector<8x32xf32>, vector<32x32xf32>, vector<8x32xf32> -> vector<8x32xf32>
    %95 = arith.addf %91, %94 : vector<8x32xf32>
    %cst_38 = arith.constant dense<0.000000e+00> : vector<8xf32>
    %96 = vector.multi_reduction <add>, %95, %cst_38 [1] : vector<8x32xf32> to vector<8xf32>
    %97 = vector.shape_cast %96 : vector<8xf32> to vector<8x1xf32>
    %cst_39 = arith.constant 3.200000e+01 : f32
    %98 = vector.broadcast %cst_39 : f32 to vector<8x1xf32>
    %99 = arith.divf %97, %98 : vector<8x1xf32>
    %100 = vector.broadcast %99 : vector<8x1xf32> to vector<8x32xf32>
    %101 = arith.subf %95, %100 : vector<8x32xf32>
    %102 = arith.mulf %101, %101 : vector<8x32xf32>
    %cst_40 = arith.constant dense<0.000000e+00> : vector<8xf32>
    %103 = vector.multi_reduction <add>, %102, %cst_40 [1] : vector<8x32xf32> to vector<8xf32>
    %104 = vector.shape_cast %103 : vector<8xf32> to vector<8x1xf32>
    %cst_41 = arith.constant 3.200000e+01 : f32
    %105 = vector.broadcast %cst_41 : f32 to vector<8x1xf32>
    %106 = arith.divf %104, %105 : vector<8x1xf32>
    %cst_42 = arith.constant 9.99999996E-13 : f32
    %107 = vector.broadcast %cst_42 : f32 to vector<8x1xf32>
    %108 = arith.addf %106, %107 : vector<8x1xf32>
    %109 = math.rsqrt %108 : vector<8x1xf32>
    %110 = vector.broadcast %109 : vector<8x1xf32> to vector<8x32xf32>
    %111 = arith.mulf %101, %110 : vector<8x32xf32>
    %c0_43 = arith.constant 0 : index
    %c0_44 = arith.constant 0 : index
    %112 = vector.load %arg7[%c0_43, %c0_44] : memref<1x32xf32, #tpu.memory_space<vmem>>, vector<1x32xf32>
    %113 = vector.broadcast %112 : vector<1x32xf32> to vector<8x32xf32>
    %114 = arith.mulf %111, %113 : vector<8x32xf32>
    %c0_45 = arith.constant 0 : index
    %c0_46 = arith.constant 0 : index
    %115 = vector.load %arg8[%c0_45, %c0_46] : memref<1x32xf32, #tpu.memory_space<vmem>>, vector<1x32xf32>
    %116 = vector.broadcast %115 : vector<1x32xf32> to vector<8x32xf32>
    %117 = arith.addf %114, %116 : vector<8x32xf32>
    %118 = vector.shape_cast %117 : vector<8x32xf32> to vector<1x8x32xf32>
    %c0_47 = arith.constant 0 : index
    %c0_48 = arith.constant 0 : index
    %c0_49 = arith.constant 0 : index
    %119 = vector.load %arg9[%c0_47, %c0_48, %c0_49] : memref<1x8x32xf32, #tpu.memory_space<vmem>>, vector<1x8x32xf32>
    tpu.vector_store %arg9[%c0_47, %c0_48, %c0_49], %118 {strides = array<i32>} : memref<1x8x32xf32, #tpu.memory_space<vmem>>, vector<1x8x32xf32>,
    return
  }
  func.func @transform_0(%arg0: i32) -> (i32, i32, i32) {
    %c0_i32 = arith.constant 0 : i32
    %c0_i32_0 = arith.constant 0 : i32
    %c0_i32_1 = arith.constant 0 : i32
    return %arg0, %c0_i32, %c0_i32_0 : i32, i32, i32
  }
  func.func @transform_1(%arg0: i32) -> (i32, i32, i32, i32) {
    %c0_i32 = arith.constant 0 : i32
    %c0_i32_0 = arith.constant 0 : i32
    %c0_i32_1 = arith.constant 0 : i32
    %c0_i32_2 = arith.constant 0 : i32
    return %arg0, %c0_i32, %c0_i32_0, %c0_i32_1 : i32, i32, i32, i32
  }
  func.func @transform_2(%arg0: i32) -> (i32, i32) {
    %c0_i32 = arith.constant 0 : i32
    %c0_i32_0 = arith.constant 0 : i32
    %c0_i32_1 = arith.constant 0 : i32
    return %c0_i32, %c0_i32_0 : i32, i32
  }
  func.func @transform_3(%arg0: i32) -> (i32, i32) {
    %c0_i32 = arith.constant 0 : i32
    %c0_i32_0 = arith.constant 0 : i32
    %c0_i32_1 = arith.constant 0 : i32
    return %c0_i32, %c0_i32_0 : i32, i32
  }
  func.func @transform_4(%arg0: i32) -> (i32, i32) {
    %c0_i32 = arith.constant 0 : i32
    %c0_i32_0 = arith.constant 0 : i32
    %c0_i32_1 = arith.constant 0 : i32
    return %c0_i32, %c0_i32_0 : i32, i32
  }
  func.func @transform_5(%arg0: i32) -> (i32, i32) {
    %c0_i32 = arith.constant 0 : i32
    %c0_i32_0 = arith.constant 0 : i32
    %c0_i32_1 = arith.constant 0 : i32
    return %c0_i32, %c0_i32_0 : i32, i32
  }
  func.func @transform_6(%arg0: i32) -> (i32, i32) {
    %c0_i32 = arith.constant 0 : i32
    %c0_i32_0 = arith.constant 0 : i32
    %c0_i32_1 = arith.constant 0 : i32
    return %c0_i32, %c0_i32_0 : i32, i32
  }
  func.func @transform_7(%arg0: i32) -> (i32, i32) {
    %c0_i32 = arith.constant 0 : i32
    %c0_i32_0 = arith.constant 0 : i32
    %c0_i32_1 = arith.constant 0 : i32
    return %c0_i32, %c0_i32_0 : i32, i32
  }
  func.func @transform_8(%arg0: i32) -> (i32, i32, i32) {
    %c0_i32 = arith.constant 0 : i32
    %c0_i32_0 = arith.constant 0 : i32
    %c0_i32_1 = arith.constant 0 : i32
    return %arg0, %c0_i32, %c0_i32_0 : i32, i32, i32
  }
}

</mosaic_0001>

<bundles_post_ra>
// kernel: tpu_custom_call.1
= control target key start
LH: loop header
LB: loop body
LE: loop exit
PB: predicated region body
PF: predicated region fallthrough
CT: control target
= control target key end

     0   :  { %s1625_s0 = inlined_call_operand.hbm [shape: f32[2,8,32], index: 0, kind: input, shape index: {}]   ;;  %s1626_s1 = inlined_call_operand.hbm [shape: f32[2,1,1,8], index: 1, kind: input, shape index: {}]   ;;  %s1627_s2 = inlined_call_operand.hbm [shape: f32[32,96], index: 2, kind: input, shape index: {}]   ;;  %s1628_s3 = inlined_call_operand.vmem [shape: f32[1,96], index: 3, kind: input, shape index: {}]   ;;  %s1629_s4 = inlined_call_operand.hbm [shape: f32[32,32], index: 4, kind: input, shape index: {}]   ;;  %s1630_s5 = inlined_call_operand.vmem [shape: f32[1,32], index: 5, kind: input, shape index: {}]   ;;  %s1631_s6 = inlined_call_operand.vmem [shape: f32[1,32], index: 6, kind: input, shape index: {}]   ;;  %s1632_s7 = inlined_call_operand.vmem [shape: f32[1,32], index: 7, kind: input, shape index: {}]   ;;  %s1633_s8 = inlined_call_operand.hbm [shape: f32[2,8,32], index: 8, kind: output, shape index: {}]  }
   0x1   :  { %1638 = sst [smem:[#allocation21_spill]] %s1627_s2 }
   0x2   :  { %1639 = sst [smem:[#allocation22_spill]] %s1629_s4 }
   0x3   :  { %13 = vsyncpa [#allocation4], 0 }
   0x4   :  { %15 = vsyncpa [#allocation4 + $0x1], 0 }
   0x5   :  { %16 = vsyncpa [#allocation7], 0 }
   0x6   :  { %18 = vsyncpa [#allocation7 + $0x1], 0 }
   0x7   :  { %19 = vsyncpa [#allocation10], 0 }
   0x8   :  { %20 = vsyncpa [#allocation5], 0 }
   0x9   :  { %22 = vsyncpa [#allocation5 + $0x1], 0  ;;  %s1365_s27 = smov 0   ;;  %s1367_s28 = smov 0  }
   0xa   :  { %s1369_s29 = smov 0   ;;  %s1371_s30 = smov 0  }
   0xb LB: > { %1640 = sst [smem:[#allocation17_spill]] %s1295_s29  ;;  %s1389_s12 = sadd.s32 4294967295, %s1299_s30   ;;  %s1299_s30 = sphi %s1371_s30, %s1654_s30   ;;  %s1295_s29 = sphi %s1369_s29, %s1656_s29   ;;  %s1291_s28 = sphi %s1367_s28, %s1658_s28   ;;  %s1287_s27 = sphi %s1365_s27, %s1657_s27  }
   0xc   : > { %s1641_s2 = sld [smem:[#allocation21_spill]]  ;;  %p958_p0 = scmp.ge.s32.totalorder %s1299_s30, 1 }
   0xd   : > { %p49_p1 = scmp.eq.s32.totalorder %s1389_s12, 0  ;;  %p237_p2 = scmp.lt.s32.totalorder %s1299_s30, 3 }
   0xe   : > { %s1301_s14 = smov [#allocation8]   ;;  %s1643_s4 = sld [smem:[#allocation22_spill]] }
   0xf   : > { %p1394_p3 = pnand %p958_p0, %p237_p2  ;;  %s250_s15 = sshll.u32 %s1301_s14, 4  ;;  %s251_s15 = int_to_ptr.vmem [resolvable:$true] %s250_s15 }
  0x10   : > { %s1302_s19 = smov [#allocation9]   ;;  %s1303_s21 = smov 128  }
  0x11   : > { %p1001_p4 = pneg %p1394_p3  ;;  %s267_s20 = sshll.u32 %s1302_s19, 4  ;;  %s268_s20 = int_to_ptr.vmem [resolvable:$true] %s267_s20 }
  0x12   : > { %s248_s11 = sshll.u32 %s1641_s2, 4  ;;  %s1304_s22 = smov 8   ;;  %s249_s11 = int_to_ptr.hbm [resolvable:$true] %s248_s11 }
  0x13   : > { %p1002_p6 = pnand %p1001_p4, %p49_p1  ;;  %s957_s23 = sadd.s32 4294967294, %s1299_s30  }
  0x14   : > { %s265_s18 = sshll.u32 %s1643_s4, 4  ;;  %s1408_s24 = sadd.s32 1, %s1299_s30   ;;  %s266_s18 = int_to_ptr.hbm [resolvable:$true] %s265_s18 }
  0x15   : > { %1004 = dma.hbm_to_vmem [thread:$0]  (!%p1002_p6), %s249_s11, 512, %s251_s15, [#allocation7], %s1303_s21, %s1303_s21, %s1304_s22  }
  0x16   : > { %1007 = dma.hbm_to_vmem [thread:$0]  (!%p1002_p6), %s266_s18, 512, %s268_s20, [#allocation10], %s1303_s21, %s1303_s21, %s1304_s22  }
  0x17   : > { %1644 = sst [smem:[#allocation18_spill]] %s1408_s24  ;;  %s32_s25 = ssub.s32 %s1299_s30, %s1408_s24 }
  0x18   : > { %s35_s26 = sadd.s32 1, %s1295_s29  ;;  %p33_p7 = scmp.eq.s32.totalorder %s32_s25, 0 }
  0x19   : > { %p42_p8 = scmp.ne.s32.totalorder %s1295_s29, %s1291_s28  ;;  %p43_p9 = scmp.eq.s32.totalorder %s1299_s30, 0 }
  0x1a   : > { %p48_p10 = scmp.ne.s32.totalorder %s1291_s28, %s1287_s27  ;;  %p224_p13 = scmp.eq.s32.totalorder %s1389_s12, 1 }
  0x1b   : > { %s1419_s9 = scalar_select %p33_p7, %s1295_s29, %s35_s26  }
  0x1c   : > { %p1421_p11 = por %p43_p9, %p42_p8  ;;  %p1427_p12 = por %p49_p1, %p48_p10 }
  0x1d   : > { %1645 = sst [smem:[#allocation19_spill]] %s1419_s9  ;;  %p230_p0 = scmp.eq.s32.totalorder %s957_s23, 1 }
  0x1e   : > { %p1021_p2 = scmp.lt.s32.totalorder %s1299_s30, 2  ;;  %s1434_s14 = sand.u32 1, %s1295_s29  }
  0x1f   : > { %p1436_p4 = por %p224_p13, %p42_p8  ;;  %p1440_p6 = por %p230_p0, %p48_p10 }
  0x20   : > { %s962_s17 = sshll.u32 %s1434_s14, 3  ;;  %s963_s18 = sshll.u32 %s1299_s30, 3 }
  0x21   : > { %s1649_s16 = scalar_select %p1440_p6, 1, 0 }
  0x22   : > { %s298_s21 = scalar_lea.hbm %s1625_s0, %s963_s18  ;;  %s294_s22 = scalar_lea.vmem [#allocation3], %s962_s17 }
  0x23   : > { %1650 = sst [smem:[#allocation20_spill]] %s1649_s16  ;;  %s302_s23 = sshll.u32 %s294_s22, 4  ;;  %s303_s23 = int_to_ptr.vmem [resolvable:$true] %s302_s23 }
  0x24   : > { %s300_s25 = sshll.u32 %s298_s21, 4  ;;  %p1451_p7 = pnand %p1021_p2, %p1421_p11  ;;  %s301_s25 = int_to_ptr.hbm [resolvable:$true] %s300_s25 }
  0x25   : > { %s309_s2 = sand.u32 1, %s1299_s30   ;;  %s291_s4 = scalar_lea.sflag [#allocation4], %s1434_s14 }
  0x26   : > { %s1161_s9 = sshra.s32 %s301_s25, 4  ;;  %p1165_p9 = pneg %p1451_p7  ;;  %s1162_s9 = int_to_ptr.hbm [resolvable:$true] %s1161_s9 }
  0x27   : > { %s1163_s29 = scalar_lea.hbm %s1162_s9, 8  ;;  %s1168_s18 = scalar_lea.hbm %s1625_s0, 16 }
  0x28   : > { %p1164_p8 = scmp.ne.s32.totalorder %s1162_s9, %s1163_s29  ;;  %p1169_p11 = scmp.lt.s32.totalorder %s1162_s9, %s1625_s0 }
  0x29   : > { %p1170_p0 = scmp.lt.s32.totalorder %s1168_s18, %s1163_s29 }
  0x2a   : > { %p1166_p10 = pnand %p1165_p9, %p1164_p8 }
  0x2b   : > { %p1171_p2 = por %p1170_p0, %p1169_p11 }
  0x2c   : > { %p1167_p13 = pneg %p1166_p10 }
  0x2e   : > { %p1172_p5 = pnand %p1171_p2, %p1167_p13 }
  0x30   : > { %1175 = shalt.err (!%p1172_p5)
}
  0x31   : > { %1011 = dma.hbm_to_vmem [thread:$0]  (!%p1451_p7), %s301_s25, 128, %s303_s23, %s291_s4  }
  0x32   : > { %s315_s24 = scalar_lea.hbm %s1626_s1, %s1299_s30  ;;  %s312_s17 = scalar_lea.vmem [#allocation6], %s1434_s14 }
  0x33   : > { %s319_s10 = sshll.u32 %s312_s17, 4  ;;  %s317_s16 = sshll.u32 %s315_s24, 4  ;;  %s320_s10 = int_to_ptr.vmem [resolvable:$true] %s319_s10  ;;  %s318_s16 = int_to_ptr.hbm [resolvable:$true] %s317_s16 }
  0x34   : > { %s310_s9 = scalar_lea.sflag [#allocation7], %s309_s2  ;;  %s1191_s29 = sshra.s32 %s318_s16, 4  ;;  %s1192_s29 = int_to_ptr.hbm [resolvable:$true] %s1191_s29 }
  0x35   : > { %s1193_s18 = scalar_lea.hbm %s1192_s29, 1  ;;  %s1198_s23 = scalar_lea.hbm %s1626_s1, 2 }
  0x36   : > { %p1194_p5 = scmp.ne.s32.totalorder %s1192_s29, %s1193_s18  ;;  %p1199_p13 = scmp.lt.s32.totalorder %s1192_s29, %s1626_s1 }
  0x37   : > { %p1200_p11 = scmp.lt.s32.totalorder %s1198_s23, %s1193_s18 }
  0x38   : > { %p1196_p8 = pnand %p1194_p5, %p1165_p9 }
  0x39   : > { %p1201_p0 = por %p1200_p11, %p1199_p13 }
  0x3a   : > { %p1197_p10 = pneg %p1196_p8 }
  0x3c   : > { %p1202_p2 = pnand %p1201_p0, %p1197_p10 }
  0x3e   : > { %1205 = shalt.err (!%p1202_p2)
}
  0x3f   : > { %1014 = dma.hbm_to_vmem [thread:$0]  (!%p1451_p7), %s318_s16, 16, %s320_s10, %s310_s9  }
  0x40   : > { %328 = sbr.rel (%p1394_p3) target bundleno = 1407 (0x57f), region = 52  ;;  %s1489_s2 = sand.u32 (!%p1394_p3), 1, %s1291_s28  }
  0x41   : > { %s965_s24 = sshll.u32 (!%p1394_p3), %s1489_s2, 3  ;;  %s331_s14 = scalar_lea.sflag (!%p1394_p3), [#allocation4], %s1489_s2 }
  0x42   : > { %s334_s21 = scalar_lea.vmem (!%p1394_p3), [#allocation3], %s965_s24 }
  0x45   : > { %1266 = dma.done.wait (%p1427_p12), %s331_s14, 128  }
  0x46   : > { %1268 = vsyncadd (%p1427_p12), %s331_s14, 4294967168  ;;  %s340_s13 = sand.u32 1, %s1389_s12   ;;  %s343_s26 = scalar_lea.vmem [#allocation6], %s1489_s2 }
  0x47   : > { %s341_s16 = scalar_lea.sflag [#allocation7], %s340_s13 }
  0x48   : > { %1270 = dma.done.wait (%p1427_p12), %s341_s16, 16  }
  0x49   : > { %1272 = vsyncadd (%p1427_p12), %s341_s16, 4294967280 }
  0x4a   : > { %1274 = dma.done.wait (%p49_p1), [#allocation7], 512  }
  0x4b   : > { %1276 = vsyncadd (%p49_p1), [#allocation7], 4294966784 }
  0x4c   : > { %1278 = dma.done.wait (%p49_p1), [#allocation10], 512  }
  0x4d   : > { %1280 = vsyncadd (%p49_p1), [#allocation10], 4294966784  ;;  %v395_v0 = vld [vmem:[#allocation8 + $0x18] sm:$0xff]  ;;  %v394_v1 = vld [vmem:[#allocation8 + $0x10] sm:$0xff]  ;;  %vm400_vm0 = vcmask 261120   ;;  %s1305_s17 = smov 72  }
  0x4e   : > { %416 = vmatpush.msra.mxu0 %v395_v0  ;;  %v393_v2 = vld [vmem:[#allocation8 + $0x8] sm:$0xff]  ;;  %v392_v3 = vld [vmem:[#allocation8] sm:$0xff]  ;;  %s1306_s10 = smov 120   ;;  %s1307_s9 = smov 96   ;;  %vm431_vm1 = vcmask 64512  }
  0x4f   : > { %v1513_v4 = vld [vmem:[%s334_s21] sm:$0xff]  ;;  %v1076_v5 = vld [vmem:[%s1628_s3] ss:$0 sm:$0xff]  ;;  %s1308_s29 = smov 112   ;;  %s1309_s18 = smov 80  }
  0x50   : > { %417 = vmatpush.msra.mxu0 %v394_v1  ;;  %s1310_s19 = smov 88   ;;  %s1311_s4 = smov 104   ;;  %v1077_v15 = vld [vmem:[%s343_s26] ss:$0 sm:$0xff] }
  0x51   : > { %s1312_s23 = smov 56   ;;  %s1313_s25 = smov 40  }
  0x52   : > { %418 = vmatpush.msra.mxu0 %v393_v2  ;;  %s1314_s20 = smov 64   ;;  %s1315_s14 = smov 48  }
  0x53   : > { %s1316_s21 = smov 8   ;;  %s1317_s13 = smov 24  }
  0x54   : > { %419 = vmatpush.msra.mxu0 %v392_v3  ;;  %s1318_s16 = smov 16   ;;  %s984_s22 = sshll.u32 %s1389_s12, 3 }
  0x55   : > { %969 = vmatmul.msk.f32.vlgmr.msra.gmra.mxu0 %vm400_vm0, %v1513_v4  ;;  %s390_s12 = scalar_lea.vmem [#allocation11], %s965_s24  ;;  %s1241_s24 = scalar_lea.hbm %s1633_s8, 16 }
  0xd2   : > { %v421_v6 = vpop.f32.mrf.mxu0 }
  0xd3   : > { %v1520_v7 = vadd.f32 %v1076_v5, %v421_v6 }
  0xd5   : > { %677 = vrot.lane.b32.xlu2 %v1520_v7, %s1305_s17  ;;  %507 = vrot.lane.b32.xlu1 %v1520_v7, %s1306_s10 }
  0xd6   : > { %429 = vrot.lane.b32.xlu0 %v1520_v7, %s1307_s9 }
  0xdd   : > { %591 = vrot.lane.b32.xlu2 %v1520_v7, %s1308_s29  ;;  %593 = vrot.lane.b32.xlu1 %v1520_v7, %s1309_s18  ;;  %s844_s18 = scalar_lea.hbm %s1633_s8, %s984_s22 }
  0xde   : > { %509 = vrot.lane.b32.xlu0 %v1520_v7, %s1310_s19 }
  0xe6   : > { %675 = vrot.lane.b32.xlu0 %v1520_v7, %s1311_s4 }
 0x12f   : > { %v678_v8 = vpop.permute.xlu2 %677 }
 0x130   : > { %979 = vmatpush.xpose.msk.msrb.mxu0 %vm431_vm1, %v678_v8 }
 0x137   : > { %v592_v13 = vpop.permute.xlu2 %591 }
 0x147   : > { %v508_v9 = vpop.permute.xlu1 %507 }
 0x148   : > { %v430_v10 = vpop.permute.xlu0 %429 }
 0x149   : > { %970 = vmatpush.xpose.msk.msra.mxu1 %vm431_vm1, %v430_v10 }
 0x14c   : > { %971 = vmatmul.msk.f32.vlgmr.msra.gmra.mxu1 %vm431_vm1, %v1520_v7 }
 0x14f   : > { %v594_v11 = vpop.permute.xlu1 %593 }
 0x150   : > { %v510_v12 = vpop.permute.xlu0 %509  ;;  %976 = vmatpush.xpose.msk.msrb.mxu1 %vm431_vm1, %v594_v11 }
 0x151   : > { %973 = vmatpush.xpose.msk.msra.mxu3 %vm431_vm1, %v510_v12 }
 0x154   : > { %974 = vmatmul.msk.f32.vlgmr.msra.gmra.mxu3 %vm431_vm1, %v508_v9  ;;  %977 = vmatmul.msk.f32.vlgmr.msrb.gmra.mxu1 %vm431_vm1, %v592_v13 }
 0x158   : > { %v676_v14 = vpop.permute.xlu0 %675 }
 0x159   : > { %980 = vmatmul.msk.f32.vlgmr.msrb.gmra.mxu0 %vm431_vm1, %v676_v14 }
 0x1c9   : > { %v453_v16 = vpop.f32.mrf.mxu1 }
 0x1ca   : > { %v454_v17 = vadd.f32 %v1077_v15, %v453_v16 }
 0x1cc   : > { %v456_v18 = vsel %vm431_vm1, %v454_v17, -inf }
 0x1cd   : > { %457 = vmax.xlane.f32.xlu1 %v456_v18 }
 0x1d1   : > { %v616_v19 = vpop.f32.mrf.mxu1 }
 0x1d2   : > { %v617_v20 = vadd.f32 %v1077_v15, %v616_v19 }
 0x1d4   : > { %v619_v21 = vsel %vm431_vm1, %v617_v20, -inf }
 0x1d5   : > { %620 = vmax.xlane.f32.xlu0 %v619_v21 }
 0x1d6   : > { %v700_v25 = vpop.f32.mrf.mxu0 }
 0x1d7   : > { %v532_v22 = vpop.f32.mrf.mxu3  ;;  %v701_v26 = vadd.f32 %v1077_v15, %v700_v25 }
 0x1d8   : > { %v533_v23 = vadd.f32 %v1077_v15, %v532_v22 }
 0x1d9   : > { %v703_v27 = vsel %vm431_vm1, %v701_v26, -inf }
 0x1da   : > { %v535_v24 = vsel %vm431_vm1, %v533_v23, -inf }
 0x1db   : > { %536 = vmax.xlane.f32.xlu2 %v535_v24 }
 0x1e3   : > { %704 = vmax.xlane.f32.xlu2 %v703_v27 }
 0x1e9   : > { %559 = vrot.lane.b32.xlu0 %v1520_v7, %s1312_s23  ;;  %s846_s23 = sshll.u32 %s390_s12, 4  ;;  %s847_s23 = int_to_ptr.vmem [resolvable:$true] %s846_s23 }
 0x240   : > { %v458_v28 = vpop.xlane.xlu1 %457 }
 0x241   : > { %v459_v29 = vsub.f32 %v454_v17, %v458_v28 }
 0x243   : > { %v460_v30 = vmul.f32 1.442695, %v459_v29 }
 0x245   : > { %1081 = vpow2.f32 %v460_v30 }
 0x248   : > { %v621_v31 = vpop.xlane.xlu0 %620 }
 0x249   : > { %v622_v32 = vsub.f32 %v617_v20, %v621_v31 }
 0x24b   : > { %v1082_v33 = vpop.eup %1081  ;;  %v623_v34 = vmul.f32 1.442695, %v622_v32 }
 0x24c   : > { %v462_v35 = vsel %vm431_vm1, %v1082_v33, 0.0 }
 0x24d   : > { %1083 = vpow2.f32 %v623_v34  ;;  %463 = vadd.xlane.f32.xlu1 %v462_v35 }
 0x24e   : > { %v537_v36 = vpop.xlane.xlu2 %536 }
 0x24f   : > { %v538_v37 = vsub.f32 %v533_v23, %v537_v36 }
 0x251   : > { %v539_v38 = vmul.f32 1.442695, %v538_v37 }
 0x253   : > { %v1546_v39 = vpop.eup %1083  ;;  %1085 = vpow2.f32 %v539_v38 }
 0x254   : > { %v625_v40 = vsel %vm431_vm1, %v1546_v39, 0.0 }
 0x255   : > { %626 = vadd.xlane.f32.xlu0 %v625_v40 }
 0x256   : > { %v705_v41 = vpop.xlane.xlu2 %704 }
 0x257   : > { %v706_v42 = vsub.f32 %v701_v26, %v705_v41 }
 0x259   : > { %v1550_v43 = vpop.eup %1085  ;;  %v707_v44 = vmul.f32 1.442695, %v706_v42 }
 0x25a   : > { %v541_v45 = vsel %vm431_vm1, %v1550_v43, 0.0 }
 0x25b   : > { %1087 = vpow2.f32 %v707_v44  ;;  %542 = vadd.xlane.f32.xlu2 %v541_v45  ;;  %v560_v49 = vpop.permute.xlu0 %559  ;;  %v766_v44 = vld [vmem:[#allocation9 + $0x8] sm:$0xff]  ;;  %v765_v45 = vld [vmem:[#allocation9] sm:$0xff] }
 0x261   : > { %v1554_v46 = vpop.eup %1087 }
 0x262   : > { %v709_v47 = vsel %vm431_vm1, %v1554_v46, 0.0 }
 0x263   : > { %710 = vadd.xlane.f32.xlu1 %v709_v47 }
 0x269   : > { %727 = vrot.lane.b32.xlu0 %v1520_v7, %s1313_s25  ;;  %s848_s25 = sshll.u32 %s844_s18, 4  ;;  %s849_s25 = int_to_ptr.hbm [resolvable:$true] %s848_s25 }
 0x273   : > { %480 = vrot.lane.b32.xlu2 %v1520_v7, %s1314_s20  ;;  %s834_s20 = scalar_lea.sflag [#allocation5], %s1489_s2 }
 0x27c   : > { %643 = vrot.lane.b32.xlu1 %v1520_v7, %s1315_s14  ;;  %s1235_s14 = sshra.s32 %s849_s25, 4  ;;  %s1236_s14 = int_to_ptr.hbm [resolvable:$true] %s1235_s14 }
 0x27d   : > { %p1242_p7 = scmp.lt.s32.totalorder %s1236_s14, %s1633_s8 }
 0x2c0   : > { %v464_v48 = vpop.xlane.xlu1 %463 }
 0x2c1   : > { %1089 = vrcp.f32 %v464_v48  ;;  %v476_v55 = vand.u32 2147483648, %v464_v48  ;;  %vm470_vm3 = vweird.f32 %v464_v48  ;;  %v474_v58 = vand.u32 2147483647, %v464_v48 }
 0x2c3   : > { %v477_v60 = vor.u32 1.1754944e-38, %v476_v55  ;;  %vm475_vm5 = vcmp.eq.f32.partialorder %v474_v58, 8.507059e+37 }
 0x2c7   : > { %v1090_v50 = vpop.eup %1089 }
 0x2c8   : > { %v466_v51 = vmul.f32 %v1090_v50, %v464_v48  ;;  %v1561_v53 = vpop.xlane.xlu0 %626  ;;  %vm471_vm2 = vweird.f32 %v1090_v50 }
 0x2c9   : > { %1091 = vrcp.f32 %v1561_v53  ;;  %vm472_vm4 = vmor %vm470_vm3, %vm471_vm2  ;;  %v639_v26 = vand.u32 2147483648, %v1561_v53  ;;  %vm633_vm14 = vweird.f32 %v1561_v53  ;;  %v637_v28 = vand.u32 2147483647, %v1561_v53 }
 0x2ca   : > { %v467_v52 = vsub.f32 1.0, %v466_v51 }
 0x2cb   : > { %vm638_vm3 = vcmp.eq.f32.partialorder %v637_v28, 8.507059e+37 }
 0x2cc   : > { %v468_v54 = vmul.f32 %v1090_v50, %v467_v52 }
 0x2ce   : > { %v543_v56 = vpop.xlane.xlu2 %542  ;;  %v469_v57 = vadd.f32 %v1090_v50, %v468_v54  ;;  %v1319_v54 = vmov 32.0  }
 0x2cf   : > { %1093 = vrcp.f32 %v543_v56  ;;  %v1092_v62 = vpop.eup %1091  ;;  %v555_v7 = vand.u32 2147483648, %v543_v56  ;;  %v553_v9 = vand.u32 2147483647, %v543_v56  ;;  %vm549_vm7 = vweird.f32 %v543_v56 }
 0x2d0   : > { %v473_v59 = vsel %vm472_vm4, %v1090_v50, %v469_v57  ;;  %v629_v5 = vmul.f32 %v1092_v62, %v1561_v53  ;;  %vm634_vm11 = vweird.f32 %v1092_v62  ;;  %vm589_vm4 = vcmask 130112  }
 0x2d1   : > { %v478_v61 = vsel %vm475_vm5, %v477_v60, %v473_v59  ;;  %v556_v14 = vor.u32 1.1754944e-38, %v555_v7  ;;  %vm554_vm9 = vcmp.eq.f32.partialorder %v553_v9, 8.507059e+37  ;;  %vm635_vm2 = vmor %vm633_vm14, %vm634_vm11  ;;  %vm757_vm5 = vcmask 261312  }
 0x2d2   : > { %v479_v3 = vmul.f32 %v1082_v33, %v478_v61  ;;  %v630_v11 = vsub.f32 1.0, %v629_v5  ;;  %v640_v33 = vor.u32 1.1754944e-38, %v639_v26 }
 0x2d4   : > { %v631_v18 = vmul.f32 %v1092_v62, %v630_v11  ;;  %v1079_v11 = vld [vmem:[%s1631_s6] ss:$0 sm:$0xff] }
 0x2d5   : > { %v1094_v63 = vpop.eup %1093 }
 0x2d6   : > { %v545_v0 = vmul.f32 %v1094_v63, %v543_v56  ;;  %v711_v1 = vpop.xlane.xlu1 %710  ;;  %v481_v2 = vpop.permute.xlu2 %480  ;;  %vm550_vm6 = vweird.f32 %v1094_v63  ;;  %v632_v24 = vadd.f32 %v1092_v62, %v631_v18 }
 0x2d7   : > { %1095 = vrcp.f32 %v711_v1  ;;  %501 = vmatpush.msra.mxu2 %v481_v2  ;;  %vm551_vm8 = vmor %vm549_vm7, %vm550_vm6  ;;  %v723_v21 = vand.u32 2147483648, %v711_v1  ;;  %v721_v23 = vand.u32 2147483647, %v711_v1  ;;  %vm717_vm12 = vweird.f32 %v711_v1 }
 0x2d8   : > { %v546_v6 = vsub.f32 1.0, %v545_v0  ;;  %972 = vmatmul.msk.f32.vlgmr.msra.gmra.mxu2 %vm431_vm1, %v479_v3  ;;  %v636_v32 = vsel %vm635_vm2, %v1092_v62, %v632_v24  ;;  %1097 = vrcp.f32 %v1319_v54 }
 0x2d9   : > { %580 = vmatpush.msrb.mxu2 %v560_v49  ;;  %v724_v27 = vor.u32 1.1754944e-38, %v723_v21  ;;  %vm722_vm15 = vcmp.eq.f32.partialorder %v721_v23, 8.507059e+37  ;;  %v641_v34 = vsel %vm638_vm3, %v640_v33, %v636_v32  ;;  %v1078_v49 = vld [vmem:[%s1630_s5] ss:$0 sm:$0xff] }
 0x2da   : > { %v547_v8 = vmul.f32 %v1094_v63, %v546_v6  ;;  %v642_v36 = vmul.f32 %v1546_v39, %v641_v34  ;;  %v767_v39 = vld [vmem:[#allocation9 + $0x10] sm:$0xff]  ;;  %v763_v50 = vadd.f32 %v1078_v49, %v1513_v4 }
 0x2db   : > { %v728_v10 = vpop.permute.xlu0 %727 }
 0x2dc   : > { %v548_v12 = vadd.f32 %v1094_v63, %v547_v8  ;;  %748 = vmatpush.msra.mxu2 %v728_v10 }
 0x2dd   : > { %v1096_v13 = vpop.eup %1095 }
 0x2de   : > { %v713_v15 = vmul.f32 %v1096_v13, %v711_v1  ;;  %v552_v16 = vsel %vm551_vm8, %v1094_v63, %v548_v12  ;;  %vm718_vm10 = vweird.f32 %v1096_v13  ;;  %v1098_v55 = vpop.eup %1097 }
 0x2df   : > { %v557_v17 = vsel %vm554_vm9, %v556_v14, %v552_v16  ;;  %vm719_vm13 = vmor %vm717_vm12, %vm718_vm10  ;;  %v797_v56 = vmul.f32 32.0, %v1098_v55  ;;  %vm801_vm6 = vweird.f32 %v1098_v55  ;;  %v1080_v14 = vld [vmem:[%s1632_s7] ss:$0 sm:$0xff] }
 0x2e0   : > { %v714_v19 = vsub.f32 1.0, %v713_v15  ;;  %v558_v20 = vmul.f32 %v1550_v43, %v557_v17  ;;  %v768_v43 = vld [vmem:[#allocation9 + $0x18] sm:$0xff] }
 0x2e1   : > { %784 = vmatpush.msra.mxu1 %v768_v43  ;;  %v798_v57 = vsub.f32 1.0, %v797_v56 }
 0x2e2   : > { %v715_v22 = vmul.f32 %v1096_v13, %v714_v19  ;;  %975 = vmatmul.msk.f32.vlgmr.msrb.gmra.mxu2 %vm431_vm1, %v558_v20 }
 0x2e3   : > { %785 = vmatpush.msra.mxu1 %v767_v39  ;;  %v799_v58 = vmul.f32 %v1098_v55, %v798_v57 }
 0x2e4   : > { %v716_v25 = vadd.f32 %v1096_v13, %v715_v22 }
 0x2e5   : > { %786 = vmatpush.msra.mxu1 %v766_v44  ;;  %v800_v59 = vadd.f32 %v1098_v55, %v799_v58 }
 0x2e6   : > { %v720_v29 = vsel %vm719_vm13, %v1096_v13, %v716_v25 }
 0x2e7   : > { %v725_v30 = vsel %vm722_vm15, %v724_v27, %v720_v29  ;;  %787 = vmatpush.msra.mxu1 %v765_v45  ;;  %v802_v60 = vsel %vm801_vm6, %v1098_v55, %v800_v59 }
 0x2e8   : > { %v726_v31 = vmul.f32 %v1554_v46, %v725_v30 }
 0x2ea   : > { %981 = vmatmul.msk.f32.vlgmr.msra.gmra.mxu2 %vm431_vm1, %v726_v31 }
 0x2ee   : > { %v644_v35 = vpop.permute.xlu1 %643 }
 0x2ef   : > { %664 = vmatpush.msrb.mxu3 %v644_v35 }
 0x2f0   : > { %978 = vmatmul.msk.f32.vlgmr.msrb.gmra.mxu3 %vm431_vm1, %v642_v36 }
 0x35b   : > { %v503_v37 = vpop.f32.mrf.mxu2 }
 0x35c   : > { %506 = vst.msk [vmem:[#allocation2] sm:$0xff] %vm431_vm1, %v503_v37  ;;  %vm673_vm1 = vcmask 195712  }
 0x365   : > { %v582_v38 = vpop.f32.mrf.mxu2 }
 0x366   : > { %586 = vrot.lane.b32.xlu2 %v582_v38, %s1316_s21  ;;  %s1237_s21 = scalar_lea.hbm %s1236_s14, 8 }
 0x367   : > { %p1238_p1 = scmp.ne.s32.totalorder %s1236_s14, %s1237_s21  ;;  %p1243_p9 = scmp.lt.s32.totalorder %s1241_s24, %s1237_s21 }
 0x369   : > { %p1239_p3 = pnand %p1238_p1, %p1436_p4  ;;  %p1244_p5 = por %p1243_p9, %p1242_p7 }
 0x36b   : > { %p1240_p12 = pneg %p1239_p3 }
 0x36d   : > { %v750_v40 = vpop.f32.mrf.mxu2  ;;  %p1245_p8 = pnand %p1244_p5, %p1240_p12 }
 0x36e   : > { %754 = vrot.lane.b32.xlu0 %v750_v40, %s1317_s13 }
 0x373   : > { %v666_v41 = vpop.f32.mrf.mxu3 }
 0x374   : > { %670 = vrot.lane.b32.xlu1 %v666_v41, %s1318_s16 }
 0x3c0   : > { %v587_v42 = vpop.permute.xlu2 %586 }
 0x3c1   : > { %590 = vst.msk [vmem:[#allocation2] sm:$0xff] %vm589_vm4, %v587_v42 }
 0x3e0   : > { %v755_v47 = vpop.permute.xlu0 %754 }
 0x3e6   : > { %v671_v46 = vpop.permute.xlu1 %670 }
 0x3e7   : > { %674 = vst.msk [vmem:[#allocation2] sm:$0xff] %vm673_vm1, %v671_v46 }
 0x3e8   : > { %758 = vst.msk [vmem:[#allocation2] sm:$0xff] %vm757_vm5, %v755_v47 }
 0x3ef   : > { %v764_v48 = vld [vmem:[#allocation2] sm:$0xff] }
 0x3f0   : > { %982 = vmatmul.msk.f32.vlgmr.msra.gmra.mxu1 %vm400_vm0, %v764_v48 }
 0x46d   : > { %v789_v51 = vpop.f32.mrf.mxu1 }
 0x46e   : > { %v792_v52 = vadd.f32 %v789_v51, %v763_v50 }
 0x470   : > { %v793_v53 = vsel %vm400_vm0, %v792_v52, 0.0 }
 0x471   : > { %794 = vadd.xlane.f32.xlu2 %v793_v53 }
 0x4e4   : > { %v795_v61 = vpop.xlane.xlu2 %794 }
 0x4e5   : > { %v803_v62 = vmul.f32 %v802_v60, %v795_v61 }
 0x4e7   : > { %v804_v63 = vsub.f32 %v792_v52, %v803_v62 }
 0x4e9   : > { %v805_v0 = vmul.f32 %v804_v63, %v804_v63 }
 0x4eb   : > { %v806_v4 = vsel %vm400_vm0, %v805_v0, 0.0 }
 0x4ec   : > { %807 = vadd.xlane.f32.xlu1 %v806_v4 }
 0x55f   : > { %v808_v1 = vpop.xlane.xlu1 %807 }
 0x560   : > { %v809_v2 = vmul.f32 %v808_v1, %v802_v60 }
 0x562   : > { %v810_v3 = vadd.f32 1e-12, %v809_v2 }
 0x564   : > { %1099 = vrsqrt.f32 %v810_v3  ;;  %vm817_vm8 = vweird.f32 %v810_v3 }
 0x56a   : > { %v1100_v5 = vpop.eup %1099 }
 0x56b   : > { %v812_v6 = vmul.f32 %v1100_v5, %v810_v3  ;;  %vm818_vm7 = vweird.f32 %v1100_v5 }
 0x56c   : > { %vm819_vm9 = vmor %vm817_vm8, %vm818_vm7 }
 0x56d   : > { %v813_v7 = vmul.f32 %v1100_v5, %v812_v6 }
 0x56f   : > { %v814_v8 = vmul.f32 0.5, %v813_v7 }
 0x571   : > { %v815_v9 = vsub.f32 1.5, %v814_v8 }
 0x573   : > { %v816_v10 = vmul.f32 %v1100_v5, %v815_v9 }
 0x575   : > { %v820_v12 = vsel %vm819_vm9, %v1100_v5, %v816_v10 }
 0x576   : > { %v821_v13 = vmul.f32 %v820_v12, %v804_v63 }
 0x578   : > { %v826_v15 = vmul.f32 %v1079_v11, %v821_v13 }
 0x57a   : > { %v831_v16 = vadd.f32 %v1080_v14, %v826_v15 }
 0x57c   : > { %832 = vst.msk [vmem:[%s390_s12] sm:$0xff] %vm400_vm0, %v831_v16 }
 0x57d   : > { %1248 = shalt.err (!%p1245_p8)
}
 0x57e   : > { %999 = dma.vmem_to_hbm [thread:$0]  (%p1436_p4), %s847_s23, 128, %s849_s25, %s834_s20  }
 0x57f PF: > { %s860_s22 = sand.u32 1, %s1287_s27   ;;  %p1653_p10 = scmp.ge.s32.totalorder %s1299_s30, 2 }
 0x580   : > { %s861_s17 = scalar_lea.sflag [#allocation5], %s860_s22 }
 0x581   : > { %p1016_p13 = pnand %p1653_p10, %p1440_p6 }
 0x583   : > { %p1017_p11 = pneg %p1016_p13 }
 0x585   : > { %1282 = dma.done.wait (%p1017_p11), %s861_s17, 128  }
 0x586   : > { %1284 = vsyncadd (%p1017_p11), %s861_s17, 4294967168  ;;  %s1654_s30 = sld [smem:[#allocation18_spill]]  ;;  %s1657_s27 = smov %s1291_s28 }
 0x587   : > { %s1655_s10 = sld [smem:[#allocation17_spill]] }
 0x588   : > { %s1656_s29 = sld [smem:[#allocation19_spill]] }
 0x58c   : > { %p25_p0 = scmp.ge.s32.totalorder %s1654_s30, 4  }
 0x58d   : > { %s1658_s28 = smov %s1655_s10 }
 0x58e   :  { %27 = sbr.rel (!%p25_p0) target bundleno = 11 (0xb), region = 118 }
 0x593   :  { %867 = vsyncpa [#allocation4], 1 }
 0x594   :  { %869 = vsyncpa [#allocation4 + $0x1], 1 }
 0x595   :  { %870 = vsyncpa [#allocation7], 1 }
 0x596   :  { %872 = vsyncpa [#allocation7 + $0x1], 1 }
 0x597   :  { %873 = vsyncpa [#allocation10], 1 }
 0x598   :  { %874 = vsyncpa [#allocation5], 1 }
 0x599   :  { %876 = vsyncpa [#allocation5 + $0x1], 1 }

// kernel: tpu_custom_call.1
= control target key start
LH: loop header
LB: loop body
LE: loop exit
PB: predicated region body
PF: predicated region fallthrough
CT: control target
= control target key end

     0   :  { %s1625_s0 = inlined_call_operand.hbm [shape: f32[2,8,32], index: 0, kind: input, shape index: {}]   ;;  %s1626_s1 = inlined_call_operand.hbm [shape: f32[2,1,1,8], index: 1, kind: input, shape index: {}]   ;;  %s1627_s2 = inlined_call_operand.hbm [shape: f32[32,96], index: 2, kind: input, shape index: {}]   ;;  %s1628_s3 = inlined_call_operand.vmem [shape: f32[1,96], index: 3, kind: input, shape index: {}]   ;;  %s1629_s4 = inlined_call_operand.hbm [shape: f32[32,32], index: 4, kind: input, shape index: {}]   ;;  %s1630_s5 = inlined_call_operand.vmem [shape: f32[1,32], index: 5, kind: input, shape index: {}]   ;;  %s1631_s6 = inlined_call_operand.vmem [shape: f32[1,32], index: 6, kind: input, shape index: {}]   ;;  %s1632_s7 = inlined_call_operand.vmem [shape: f32[1,32], index: 7, kind: input, shape index: {}]   ;;  %s1633_s8 = inlined_call_operand.hbm [shape: f32[2,8,32], index: 8, kind: output, shape index: {}]  }
   0x1   :  { %1638 = sst [smem:[#allocation21_spill]] %s1627_s2 }
   0x2   :  { %1639 = sst [smem:[#allocation22_spill]] %s1629_s4 }
   0x3   :  { %13 = vsyncpa [#allocation4], 0 }
   0x4   :  { %15 = vsyncpa [#allocation4 + $0x1], 0 }
   0x5   :  { %16 = vsyncpa [#allocation7], 0 }
   0x6   :  { %18 = vsyncpa [#allocation7 + $0x1], 0 }
   0x7   :  { %19 = vsyncpa [#allocation10], 0 }
   0x8   :  { %20 = vsyncpa [#allocation5], 0 }
   0x9   :  { %22 = vsyncpa [#allocation5 + $0x1], 0  ;;  %s1365_s27 = smov 0   ;;  %s1367_s28 = smov 0  }
   0xa   :  { %s1369_s29 = smov 0   ;;  %s1371_s30 = smov 0  }
   0xb LB: > { %1640 = sst [smem:[#allocation17_spill]] %s1295_s29  ;;  %s1389_s12 = sadd.s32 4294967295, %s1299_s30   ;;  %s1299_s30 = sphi %s1371_s30, %s1654_s30   ;;  %s1295_s29 = sphi %s1369_s29, %s1656_s29   ;;  %s1291_s28 = sphi %s1367_s28, %s1658_s28   ;;  %s1287_s27 = sphi %s1365_s27, %s1657_s27  }
   0xc   : > { %s1641_s2 = sld [smem:[#allocation21_spill]]  ;;  %p958_p0 = scmp.ge.s32.totalorder %s1299_s30, 1 }
   0xd   : > { %p49_p1 = scmp.eq.s32.totalorder %s1389_s12, 0  ;;  %p237_p2 = scmp.lt.s32.totalorder %s1299_s30, 3 }
   0xe   : > { %s1301_s14 = smov [#allocation8]   ;;  %s1643_s4 = sld [smem:[#allocation22_spill]] }
   0xf   : > { %p1394_p3 = pnand %p958_p0, %p237_p2  ;;  %s250_s15 = sshll.u32 %s1301_s14, 4  ;;  %s251_s15 = int_to_ptr.vmem [resolvable:$true] %s250_s15 }
  0x10   : > { %s1302_s19 = smov [#allocation9]   ;;  %s1303_s21 = smov 128  }
  0x11   : > { %p1001_p4 = pneg %p1394_p3  ;;  %s267_s20 = sshll.u32 %s1302_s19, 4  ;;  %s268_s20 = int_to_ptr.vmem [resolvable:$true] %s267_s20 }
  0x12   : > { %s248_s11 = sshll.u32 %s1641_s2, 4  ;;  %s1304_s22 = smov 8   ;;  %s249_s11 = int_to_ptr.hbm [resolvable:$true] %s248_s11 }
  0x13   : > { %p1002_p6 = pnand %p1001_p4, %p49_p1  ;;  %s957_s23 = sadd.s32 4294967294, %s1299_s30  }
  0x14   : > { %s265_s18 = sshll.u32 %s1643_s4, 4  ;;  %s1408_s24 = sadd.s32 1, %s1299_s30   ;;  %s266_s18 = int_to_ptr.hbm [resolvable:$true] %s265_s18 }
  0x15   : > { %1004 = dma.hbm_to_vmem [thread:$0]  (!%p1002_p6), %s249_s11, 512, %s251_s15, [#allocation7], %s1303_s21, %s1303_s21, %s1304_s22  }
  0x16   : > { %1007 = dma.hbm_to_vmem [thread:$0]  (!%p1002_p6), %s266_s18, 512, %s268_s20, [#allocation10], %s1303_s21, %s1303_s21, %s1304_s22  }
  0x17   : > { %1644 = sst [smem:[#allocation18_spill]] %s1408_s24  ;;  %s32_s25 = ssub.s32 %s1299_s30, %s1408_s24 }
  0x18   : > { %s35_s26 = sadd.s32 1, %s1295_s29  ;;  %p33_p7 = scmp.eq.s32.totalorder %s32_s25, 0 }
  0x19   : > { %p42_p8 = scmp.ne.s32.totalorder %s1295_s29, %s1291_s28  ;;  %p43_p9 = scmp.eq.s32.totalorder %s1299_s30, 0 }
  0x1a   : > { %p48_p10 = scmp.ne.s32.totalorder %s1291_s28, %s1287_s27  ;;  %p224_p13 = scmp.eq.s32.totalorder %s1389_s12, 1 }
  0x1b   : > { %s1419_s9 = scalar_select %p33_p7, %s1295_s29, %s35_s26  }
  0x1c   : > { %p1421_p11 = por %p43_p9, %p42_p8  ;;  %p1427_p12 = por %p49_p1, %p48_p10 }
  0x1d   : > { %1645 = sst [smem:[#allocation19_spill]] %s1419_s9  ;;  %p230_p0 = scmp.eq.s32.totalorder %s957_s23, 1 }
  0x1e   : > { %p1021_p2 = scmp.lt.s32.totalorder %s1299_s30, 2  ;;  %s1434_s14 = sand.u32 1, %s1295_s29  }
  0x1f   : > { %p1436_p4 = por %p224_p13, %p42_p8  ;;  %p1440_p6 = por %p230_p0, %p48_p10 }
  0x20   : > { %s962_s17 = sshll.u32 %s1434_s14, 3  ;;  %s963_s18 = sshll.u32 %s1299_s30, 3 }
  0x21   : > { %s1649_s16 = scalar_select %p1440_p6, 1, 0 }
  0x22   : > { %s298_s21 = scalar_lea.hbm %s1625_s0, %s963_s18  ;;  %s294_s22 = scalar_lea.vmem [#allocation3], %s962_s17 }
  0x23   : > { %1650 = sst [smem:[#allocation20_spill]] %s1649_s16  ;;  %s302_s23 = sshll.u32 %s294_s22, 4  ;;  %s303_s23 = int_to_ptr.vmem [resolvable:$true] %s302_s23 }
  0x24   : > { %s300_s25 = sshll.u32 %s298_s21, 4  ;;  %p1451_p7 = pnand %p1021_p2, %p1421_p11  ;;  %s301_s25 = int_to_ptr.hbm [resolvable:$true] %s300_s25 }
  0x25   : > { %s309_s2 = sand.u32 1, %s1299_s30   ;;  %s291_s4 = scalar_lea.sflag [#allocation4], %s1434_s14 }
  0x26   : > { %s1161_s9 = sshra.s32 %s301_s25, 4  ;;  %p1165_p9 = pneg %p1451_p7  ;;  %s1162_s9 = int_to_ptr.hbm [resolvable:$true] %s1161_s9 }
  0x27   : > { %s1163_s29 = scalar_lea.hbm %s1162_s9, 8  ;;  %s1168_s18 = scalar_lea.hbm %s1625_s0, 16 }
  0x28   : > { %p1164_p8 = scmp.ne.s32.totalorder %s1162_s9, %s1163_s29  ;;  %p1169_p11 = scmp.lt.s32.totalorder %s1162_s9, %s1625_s0 }
  0x29   : > { %p1170_p0 = scmp.lt.s32.totalorder %s1168_s18, %s1163_s29 }
  0x2a   : > { %p1166_p10 = pnand %p1165_p9, %p1164_p8 }
  0x2b   : > { %p1171_p2 = por %p1170_p0, %p1169_p11 }
  0x2c   : > { %p1167_p13 = pneg %p1166_p10 }
  0x2e   : > { %p1172_p5 = pnand %p1171_p2, %p1167_p13 }
  0x30   : > { %1175 = shalt.err (!%p1172_p5)
}
  0x31   : > { %1011 = dma.hbm_to_vmem [thread:$0]  (!%p1451_p7), %s301_s25, 128, %s303_s23, %s291_s4  }
  0x32   : > { %s315_s24 = scalar_lea.hbm %s1626_s1, %s1299_s30  ;;  %s312_s17 = scalar_lea.vmem [#allocation6], %s1434_s14 }
  0x33   : > { %s319_s10 = sshll.u32 %s312_s17, 4  ;;  %s317_s16 = sshll.u32 %s315_s24, 4  ;;  %s320_s10 = int_to_ptr.vmem [resolvable:$true] %s319_s10  ;;  %s318_s16 = int_to_ptr.hbm [resolvable:$true] %s317_s16 }
  0x34   : > { %s310_s9 = scalar_lea.sflag [#allocation7], %s309_s2  ;;  %s1191_s29 = sshra.s32 %s318_s16, 4  ;;  %s1192_s29 = int_to_ptr.hbm [resolvable:$true] %s1191_s29 }
  0x35   : > { %s1193_s18 = scalar_lea.hbm %s1192_s29, 1  ;;  %s1198_s23 = scalar_lea.hbm %s1626_s1, 2 }
  0x36   : > { %p1194_p5 = scmp.ne.s32.totalorder %s1192_s29, %s1193_s18  ;;  %p1199_p13 = scmp.lt.s32.totalorder %s1192_s29, %s1626_s1 }
  0x37   : > { %p1200_p11 = scmp.lt.s32.totalorder %s1198_s23, %s1193_s18 }
  0x38   : > { %p1196_p8 = pnand %p1194_p5, %p1165_p9 }
  0x39   : > { %p1201_p0 = por %p1200_p11, %p1199_p13 }
  0x3a   : > { %p1197_p10 = pneg %p1196_p8 }
  0x3c   : > { %p1202_p2 = pnand %p1201_p0, %p1197_p10 }
  0x3e   : > { %1205 = shalt.err (!%p1202_p2)
}
  0x3f   : > { %1014 = dma.hbm_to_vmem [thread:$0]  (!%p1451_p7), %s318_s16, 16, %s320_s10, %s310_s9  }
  0x40   : > { %328 = sbr.rel (%p1394_p3) target bundleno = 1407 (0x57f), region = 52  ;;  %s1489_s2 = sand.u32 (!%p1394_p3), 1, %s1291_s28  }
  0x41   : > { %s965_s24 = sshll.u32 (!%p1394_p3), %s1489_s2, 3  ;;  %s331_s14 = scalar_lea.sflag (!%p1394_p3), [#allocation4], %s1489_s2 }
  0x42   : > { %s334_s21 = scalar_lea.vmem (!%p1394_p3), [#allocation3], %s965_s24 }
  0x45   : > { %1266 = dma.done.wait (%p1427_p12), %s331_s14, 128  }
  0x46   : > { %1268 = vsyncadd (%p1427_p12), %s331_s14, 4294967168  ;;  %s340_s13 = sand.u32 1, %s1389_s12   ;;  %s343_s26 = scalar_lea.vmem [#allocation6], %s1489_s2 }
  0x47   : > { %s341_s16 = scalar_lea.sflag [#allocation7], %s340_s13 }
  0x48   : > { %1270 = dma.done.wait (%p1427_p12), %s341_s16, 16  }
  0x49   : > { %1272 = vsyncadd (%p1427_p12), %s341_s16, 4294967280 }
  0x4a   : > { %1274 = dma.done.wait (%p49_p1), [#allocation7], 512  }
  0x4b   : > { %1276 = vsyncadd (%p49_p1), [#allocation7], 4294966784 }
  0x4c   : > { %1278 = dma.done.wait (%p49_p1), [#allocation10], 512  }
  0x4d   : > { %1280 = vsyncadd (%p49_p1), [#allocation10], 4294966784  ;;  %v395_v0 = vld [vmem:[#allocation8 + $0x18] sm:$0xff]  ;;  %v394_v1 = vld [vmem:[#allocation8 + $0x10] sm:$0xff]  ;;  %vm400_vm0 = vcmask 261120   ;;  %s1305_s17 = smov 72  }
  0x4e   : > { %416 = vmatpush.msra.mxu0 %v395_v0  ;;  %v393_v2 = vld [vmem:[#allocation8 + $0x8] sm:$0xff]  ;;  %v392_v3 = vld [vmem:[#allocation8] sm:$0xff]  ;;  %s1306_s10 = smov 120   ;;  %s1307_s9 = smov 96   ;;  %vm431_vm1 = vcmask 64512  }
  0x4f   : > { %v1513_v4 = vld [vmem:[%s334_s21] sm:$0xff]  ;;  %v1076_v5 = vld [vmem:[%s1628_s3] ss:$0 sm:$0xff]  ;;  %s1308_s29 = smov 112   ;;  %s1309_s18 = smov 80  }
  0x50   : > { %417 = vmatpush.msra.mxu0 %v394_v1  ;;  %s1310_s19 = smov 88   ;;  %s1311_s4 = smov 104   ;;  %v1077_v15 = vld [vmem:[%s343_s26] ss:$0 sm:$0xff] }
  0x51   : > { %s1312_s23 = smov 56   ;;  %s1313_s25 = smov 40  }
  0x52   : > { %418 = vmatpush.msra.mxu0 %v393_v2  ;;  %s1314_s20 = smov 64   ;;  %s1315_s14 = smov 48  }
  0x53   : > { %s1316_s21 = smov 8   ;;  %s1317_s13 = smov 24  }
  0x54   : > { %419 = vmatpush.msra.mxu0 %v392_v3  ;;  %s1318_s16 = smov 16   ;;  %s984_s22 = sshll.u32 %s1389_s12, 3 }
  0x55   : > { %969 = vmatmul.msk.f32.vlgmr.msra.gmra.mxu0 %vm400_vm0, %v1513_v4  ;;  %s390_s12 = scalar_lea.vmem [#allocation11], %s965_s24  ;;  %s1241_s24 = scalar_lea.hbm %s1633_s8, 16 }
  0xd2   : > { %v421_v6 = vpop.f32.mrf.mxu0 }
  0xd3   : > { %v1520_v7 = vadd.f32 %v1076_v5, %v421_v6 }
  0xd5   : > { %677 = vrot.lane.b32.xlu2 %v1520_v7, %s1305_s17  ;;  %507 = vrot.lane.b32.xlu1 %v1520_v7, %s1306_s10 }
  0xd6   : > { %429 = vrot.lane.b32.xlu0 %v1520_v7, %s1307_s9 }
  0xdd   : > { %591 = vrot.lane.b32.xlu2 %v1520_v7, %s1308_s29  ;;  %593 = vrot.lane.b32.xlu1 %v1520_v7, %s1309_s18  ;;  %s844_s18 = scalar_lea.hbm %s1633_s8, %s984_s22 }
  0xde   : > { %509 = vrot.lane.b32.xlu0 %v1520_v7, %s1310_s19 }
  0xe6   : > { %675 = vrot.lane.b32.xlu0 %v1520_v7, %s1311_s4 }
 0x12f   : > { %v678_v8 = vpop.permute.xlu2 %677 }
 0x130   : > { %979 = vmatpush.xpose.msk.msrb.mxu0 %vm431_vm1, %v678_v8 }
 0x137   : > { %v592_v13 = vpop.permute.xlu2 %591 }
 0x147   : > { %v508_v9 = vpop.permute.xlu1 %507 }
 0x148   : > { %v430_v10 = vpop.permute.xlu0 %429 }
 0x149   : > { %970 = vmatpush.xpose.msk.msra.mxu1 %vm431_vm1, %v430_v10 }
 0x14c   : > { %971 = vmatmul.msk.f32.vlgmr.msra.gmra.mxu1 %vm431_vm1, %v1520_v7 }
 0x14f   : > { %v594_v11 = vpop.permute.xlu1 %593 }
 0x150   : > { %v510_v12 = vpop.permute.xlu0 %509  ;;  %976 = vmatpush.xpose.msk.msrb.mxu1 %vm431_vm1, %v594_v11 }
 0x151   : > { %973 = vmatpush.xpose.msk.msra.mxu3 %vm431_vm1, %v510_v12 }
 0x154   : > { %974 = vmatmul.msk.f32.vlgmr.msra.gmra.mxu3 %vm431_vm1, %v508_v9  ;;  %977 = vmatmul.msk.f32.vlgmr.msrb.gmra.mxu1 %vm431_vm1, %v592_v13 }
 0x158   : > { %v676_v14 = vpop.permute.xlu0 %675 }
 0x159   : > { %980 = vmatmul.msk.f32.vlgmr.msrb.gmra.mxu0 %vm431_vm1, %v676_v14 }
 0x1c9   : > { %v453_v16 = vpop.f32.mrf.mxu1 }
 0x1ca   : > { %v454_v17 = vadd.f32 %v1077_v15, %v453_v16 }
 0x1cc   : > { %v456_v18 = vsel %vm431_vm1, %v454_v17, -inf }
 0x1cd   : > { %457 = vmax.xlane.f32.xlu1 %v456_v18 }
 0x1d1   : > { %v616_v19 = vpop.f32.mrf.mxu1 }
 0x1d2   : > { %v617_v20 = vadd.f32 %v1077_v15, %v616_v19 }
 0x1d4   : > { %v619_v21 = vsel %vm431_vm1, %v617_v20, -inf }
 0x1d5   : > { %620 = vmax.xlane.f32.xlu0 %v619_v21 }
 0x1d6   : > { %v700_v25 = vpop.f32.mrf.mxu0 }
 0x1d7   : > { %v532_v22 = vpop.f32.mrf.mxu3  ;;  %v701_v26 = vadd.f32 %v1077_v15, %v700_v25 }
 0x1d8   : > { %v533_v23 = vadd.f32 %v1077_v15, %v532_v22 }
 0x1d9   : > { %v703_v27 = vsel %vm431_vm1, %v701_v26, -inf }
 0x1da   : > { %v535_v24 = vsel %vm431_vm1, %v533_v23, -inf }
 0x1db   : > { %536 = vmax.xlane.f32.xlu2 %v535_v24 }
 0x1e3   : > { %704 = vmax.xlane.f32.xlu2 %v703_v27 }
 0x1e9   : > { %559 = vrot.lane.b32.xlu0 %v1520_v7, %s1312_s23  ;;  %s846_s23 = sshll.u32 %s390_s12, 4  ;;  %s847_s23 = int_to_ptr.vmem [resolvable:$true] %s846_s23 }
 0x240   : > { %v458_v28 = vpop.xlane.xlu1 %457 }
 0x241   : > { %v459_v29 = vsub.f32 %v454_v17, %v458_v28 }
 0x243   : > { %v460_v30 = vmul.f32 1.442695, %v459_v29 }
 0x245   : > { %1081 = vpow2.f32 %v460_v30 }
 0x248   : > { %v621_v31 = vpop.xlane.xlu0 %620 }
 0x249   : > { %v622_v32 = vsub.f32 %v617_v20, %v621_v31 }
 0x24b   : > { %v1082_v33 = vpop.eup %1081  ;;  %v623_v34 = vmul.f32 1.442695, %v622_v32 }
 0x24c   : > { %v462_v35 = vsel %vm431_vm1, %v1082_v33, 0.0 }
 0x24d   : > { %1083 = vpow2.f32 %v623_v34  ;;  %463 = vadd.xlane.f32.xlu1 %v462_v35 }
 0x24e   : > { %v537_v36 = vpop.xlane.xlu2 %536 }
 0x24f   : > { %v538_v37 = vsub.f32 %v533_v23, %v537_v36 }
 0x251   : > { %v539_v38 = vmul.f32 1.442695, %v538_v37 }
 0x253   : > { %v1546_v39 = vpop.eup %1083  ;;  %1085 = vpow2.f32 %v539_v38 }
 0x254   : > { %v625_v40 = vsel %vm431_vm1, %v1546_v39, 0.0 }
 0x255   : > { %626 = vadd.xlane.f32.xlu0 %v625_v40 }
 0x256   : > { %v705_v41 = vpop.xlane.xlu2 %704 }
 0x257   : > { %v706_v42 = vsub.f32 %v701_v26, %v705_v41 }
 0x259   : > { %v1550_v43 = vpop.eup %1085  ;;  %v707_v44 = vmul.f32 1.442695, %v706_v42 }
 0x25a   : > { %v541_v45 = vsel %vm431_vm1, %v1550_v43, 0.0 }
 0x25b   : > { %1087 = vpow2.f32 %v707_v44  ;;  %542 = vadd.xlane.f32.xlu2 %v541_v45  ;;  %v560_v49 = vpop.permute.xlu0 %559  ;;  %v766_v44 = vld [vmem:[#allocation9 + $0x8] sm:$0xff]  ;;  %v765_v45 = vld [vmem:[#allocation9] sm:$0xff] }
 0x261   : > { %v1554_v46 = vpop.eup %1087 }
 0x262   : > { %v709_v47 = vsel %vm431_vm1, %v1554_v46, 0.0 }
 0x263   : > { %710 = vadd.xlane.f32.xlu1 %v709_v47 }
 0x269   : > { %727 = vrot.lane.b32.xlu0 %v1520_v7, %s1313_s25  ;;  %s848_s25 = sshll.u32 %s844_s18, 4  ;;  %s849_s25 = int_to_ptr.hbm [resolvable:$true] %s848_s25 }
 0x273   : > { %480 = vrot.lane.b32.xlu2 %v1520_v7, %s1314_s20  ;;  %s834_s20 = scalar_lea.sflag [#allocation5], %s1489_s2 }
 0x27c   : > { %643 = vrot.lane.b32.xlu1 %v1520_v7, %s1315_s14  ;;  %s1235_s14 = sshra.s32 %s849_s25, 4  ;;  %s1236_s14 = int_to_ptr.hbm [resolvable:$true] %s1235_s14 }
 0x27d   : > { %p1242_p7 = scmp.lt.s32.totalorder %s1236_s14, %s1633_s8 }
 0x2c0   : > { %v464_v48 = vpop.xlane.xlu1 %463 }
 0x2c1   : > { %1089 = vrcp.f32 %v464_v48  ;;  %v476_v55 = vand.u32 2147483648, %v464_v48  ;;  %vm470_vm3 = vweird.f32 %v464_v48  ;;  %v474_v58 = vand.u32 2147483647, %v464_v48 }
 0x2c3   : > { %v477_v60 = vor.u32 1.1754944e-38, %v476_v55  ;;  %vm475_vm5 = vcmp.eq.f32.partialorder %v474_v58, 8.507059e+37 }
 0x2c7   : > { %v1090_v50 = vpop.eup %1089 }
 0x2c8   : > { %v466_v51 = vmul.f32 %v1090_v50, %v464_v48  ;;  %v1561_v53 = vpop.xlane.xlu0 %626  ;;  %vm471_vm2 = vweird.f32 %v1090_v50 }
 0x2c9   : > { %1091 = vrcp.f32 %v1561_v53  ;;  %vm472_vm4 = vmor %vm470_vm3, %vm471_vm2  ;;  %v639_v26 = vand.u32 2147483648, %v1561_v53  ;;  %vm633_vm14 = vweird.f32 %v1561_v53  ;;  %v637_v28 = vand.u32 2147483647, %v1561_v53 }
 0x2ca   : > { %v467_v52 = vsub.f32 1.0, %v466_v51 }
 0x2cb   : > { %vm638_vm3 = vcmp.eq.f32.partialorder %v637_v28, 8.507059e+37 }
 0x2cc   : > { %v468_v54 = vmul.f32 %v1090_v50, %v467_v52 }
 0x2ce   : > { %v543_v56 = vpop.xlane.xlu2 %542  ;;  %v469_v57 = vadd.f32 %v1090_v50, %v468_v54  ;;  %v1319_v54 = vmov 32.0  }
 0x2cf   : > { %1093 = vrcp.f32 %v543_v56  ;;  %v1092_v62 = vpop.eup %1091  ;;  %v555_v7 = vand.u32 2147483648, %v543_v56  ;;  %v553_v9 = vand.u32 2147483647, %v543_v56  ;;  %vm549_vm7 = vweird.f32 %v543_v56 }
 0x2d0   : > { %v473_v59 = vsel %vm472_vm4, %v1090_v50, %v469_v57  ;;  %v629_v5 = vmul.f32 %v1092_v62, %v1561_v53  ;;  %vm634_vm11 = vweird.f32 %v1092_v62  ;;  %vm589_vm4 = vcmask 130112  }
 0x2d1   : > { %v478_v61 = vsel %vm475_vm5, %v477_v60, %v473_v59  ;;  %v556_v14 = vor.u32 1.1754944e-38, %v555_v7  ;;  %vm554_vm9 = vcmp.eq.f32.partialorder %v553_v9, 8.507059e+37  ;;  %vm635_vm2 = vmor %vm633_vm14, %vm634_vm11  ;;  %vm757_vm5 = vcmask 261312  }
 0x2d2   : > { %v479_v3 = vmul.f32 %v1082_v33, %v478_v61  ;;  %v630_v11 = vsub.f32 1.0, %v629_v5  ;;  %v640_v33 = vor.u32 1.1754944e-38, %v639_v26 }
 0x2d4   : > { %v631_v18 = vmul.f32 %v1092_v62, %v630_v11  ;;  %v1079_v11 = vld [vmem:[%s1631_s6] ss:$0 sm:$0xff] }
 0x2d5   : > { %v1094_v63 = vpop.eup %1093 }
 0x2d6   : > { %v545_v0 = vmul.f32 %v1094_v63, %v543_v56  ;;  %v711_v1 = vpop.xlane.xlu1 %710  ;;  %v481_v2 = vpop.permute.xlu2 %480  ;;  %vm550_vm6 = vweird.f32 %v1094_v63  ;;  %v632_v24 = vadd.f32 %v1092_v62, %v631_v18 }
 0x2d7   : > { %1095 = vrcp.f32 %v711_v1  ;;  %501 = vmatpush.msra.mxu2 %v481_v2  ;;  %vm551_vm8 = vmor %vm549_vm7, %vm550_vm6  ;;  %v723_v21 = vand.u32 2147483648, %v711_v1  ;;  %v721_v23 = vand.u32 2147483647, %v711_v1  ;;  %vm717_vm12 = vweird.f32 %v711_v1 }
 0x2d8   : > { %v546_v6 = vsub.f32 1.0, %v545_v0  ;;  %972 = vmatmul.msk.f32.vlgmr.msra.gmra.mxu2 %vm431_vm1, %v479_v3  ;;  %v636_v32 = vsel %vm635_vm2, %v1092_v62, %v632_v24  ;;  %1097 = vrcp.f32 %v1319_v54 }
 0x2d9   : > { %580 = vmatpush.msrb.mxu2 %v560_v49  ;;  %v724_v27 = vor.u32 1.1754944e-38, %v723_v21  ;;  %vm722_vm15 = vcmp.eq.f32.partialorder %v721_v23, 8.507059e+37  ;;  %v641_v34 = vsel %vm638_vm3, %v640_v33, %v636_v32  ;;  %v1078_v49 = vld [vmem:[%s1630_s5] ss:$0 sm:$0xff] }
 0x2da   : > { %v547_v8 = vmul.f32 %v1094_v63, %v546_v6  ;;  %v642_v36 = vmul.f32 %v1546_v39, %v641_v34  ;;  %v767_v39 = vld [vmem:[#allocation9 + $0x10] sm:$0xff]  ;;  %v763_v50 = vadd.f32 %v1078_v49, %v1513_v4 }
 0x2db   : > { %v728_v10 = vpop.permute.xlu0 %727 }
 0x2dc   : > { %v548_v12 = vadd.f32 %v1094_v63, %v547_v8  ;;  %748 = vmatpush.msra.mxu2 %v728_v10 }
 0x2dd   : > { %v1096_v13 = vpop.eup %1095 }
 0x2de   : > { %v713_v15 = vmul.f32 %v1096_v13, %v711_v1  ;;  %v552_v16 = vsel %vm551_vm8, %v1094_v63, %v548_v12  ;;  %vm718_vm10 = vweird.f32 %v1096_v13  ;;  %v1098_v55 = vpop.eup %1097 }
 0x2df   : > { %v557_v17 = vsel %vm554_vm9, %v556_v14, %v552_v16  ;;  %vm719_vm13 = vmor %vm717_vm12, %vm718_vm10  ;;  %v797_v56 = vmul.f32 32.0, %v1098_v55  ;;  %vm801_vm6 = vweird.f32 %v1098_v55  ;;  %v1080_v14 = vld [vmem:[%s1632_s7] ss:$0 sm:$0xff] }
 0x2e0   : > { %v714_v19 = vsub.f32 1.0, %v713_v15  ;;  %v558_v20 = vmul.f32 %v1550_v43, %v557_v17  ;;  %v768_v43 = vld [vmem:[#allocation9 + $0x18] sm:$0xff] }
 0x2e1   : > { %784 = vmatpush.msra.mxu1 %v768_v43  ;;  %v798_v57 = vsub.f32 1.0, %v797_v56 }
 0x2e2   : > { %v715_v22 = vmul.f32 %v1096_v13, %v714_v19  ;;  %975 = vmatmul.msk.f32.vlgmr.msrb.gmra.mxu2 %vm431_vm1, %v558_v20 }
 0x2e3   : > { %785 = vmatpush.msra.mxu1 %v767_v39  ;;  %v799_v58 = vmul.f32 %v1098_v55, %v798_v57 }
 0x2e4   : > { %v716_v25 = vadd.f32 %v1096_v13, %v715_v22 }
 0x2e5   : > { %786 = vmatpush.msra.mxu1 %v766_v44  ;;  %v800_v59 = vadd.f32 %v1098_v55, %v799_v58 }
 0x2e6   : > { %v720_v29 = vsel %vm719_vm13, %v1096_v13, %v716_v25 }
 0x2e7   : > { %v725_v30 = vsel %vm722_vm15, %v724_v27, %v720_v29  ;;  %787 = vmatpush.msra.mxu1 %v765_v45  ;;  %v802_v60 = vsel %vm801_vm6, %v1098_v55, %v800_v59 }
 0x2e8   : > { %v726_v31 = vmul.f32 %v1554_v46, %v725_v30 }
 0x2ea   : > { %981 = vmatmul.msk.f32.vlgmr.msra.gmra.mxu2 %vm431_vm1, %v726_v31 }
 0x2ee   : > { %v644_v35 = vpop.permute.xlu1 %643 }
 0x2ef   : > { %664 = vmatpush.msrb.mxu3 %v644_v35 }
 0x2f0   : > { %978 = vmatmul.msk.f32.vlgmr.msrb.gmra.mxu3 %vm431_vm1, %v642_v36 }
 0x35b   : > { %v503_v37 = vpop.f32.mrf.mxu2 }
 0x35c   : > { %506 = vst.msk [vmem:[#allocation2] sm:$0xff] %vm431_vm1, %v503_v37  ;;  %vm673_vm1 = vcmask 195712  }
 0x365   : > { %v582_v38 = vpop.f32.mrf.mxu2 }
 0x366   : > { %586 = vrot.lane.b32.xlu2 %v582_v38, %s1316_s21  ;;  %s1237_s21 = scalar_lea.hbm %s1236_s14, 8 }
 0x367   : > { %p1238_p1 = scmp.ne.s32.totalorder %s1236_s14, %s1237_s21  ;;  %p1243_p9 = scmp.lt.s32.totalorder %s1241_s24, %s1237_s21 }
 0x369   : > { %p1239_p3 = pnand %p1238_p1, %p1436_p4  ;;  %p1244_p5 = por %p1243_p9, %p1242_p7 }
 0x36b   : > { %p1240_p12 = pneg %p1239_p3 }
 0x36d   : > { %v750_v40 = vpop.f32.mrf.mxu2  ;;  %p1245_p8 = pnand %p1244_p5, %p1240_p12 }
 0x36e   : > { %754 = vrot.lane.b32.xlu0 %v750_v40, %s1317_s13 }
 0x373   : > { %v666_v41 = vpop.f32.mrf.mxu3 }
 0x374   : > { %670 = vrot.lane.b32.xlu1 %v666_v41, %s1318_s16 }
 0x3c0   : > { %v587_v42 = vpop.permute.xlu2 %586 }
 0x3c1   : > { %590 = vst.msk [vmem:[#allocation2] sm:$0xff] %vm589_vm4, %v587_v42 }
 0x3e0   : > { %v755_v47 = vpop.permute.xlu0 %754 }
 0x3e6   : > { %v671_v46 = vpop.permute.xlu1 %670 }
 0x3e7   : > { %674 = vst.msk [vmem:[#allocation2] sm:$0xff] %vm673_vm1, %v671_v46 }
 0x3e8   : > { %758 = vst.msk [vmem:[#allocation2] sm:$0xff] %vm757_vm5, %v755_v47 }
 0x3ef   : > { %v764_v48 = vld [vmem:[#allocation2] sm:$0xff] }
 0x3f0   : > { %982 = vmatmul.msk.f32.vlgmr.msra.gmra.mxu1 %vm400_vm0, %v764_v48 }
 0x46d   : > { %v789_v51 = vpop.f32.mrf.mxu1 }
 0x46e   : > { %v792_v52 = vadd.f32 %v789_v51, %v763_v50 }
 0x470   : > { %v793_v53 = vsel %vm400_vm0, %v792_v52, 0.0 }
 0x471   : > { %794 = vadd.xlane.f32.xlu2 %v793_v53 }
 0x4e4   : > { %v795_v61 = vpop.xlane.xlu2 %794 }
 0x4e5   : > { %v803_v62 = vmul.f32 %v802_v60, %v795_v61 }
 0x4e7   : > { %v804_v63 = vsub.f32 %v792_v52, %v803_v62 }
 0x4e9   : > { %v805_v0 = vmul.f32 %v804_v63, %v804_v63 }
 0x4eb   : > { %v806_v4 = vsel %vm400_vm0, %v805_v0, 0.0 }
 0x4ec   : > { %807 = vadd.xlane.f32.xlu1 %v806_v4 }
 0x55f   : > { %v808_v1 = vpop.xlane.xlu1 %807 }
 0x560   : > { %v809_v2 = vmul.f32 %v808_v1, %v802_v60 }
 0x562   : > { %v810_v3 = vadd.f32 1e-12, %v809_v2 }
 0x564   : > { %1099 = vrsqrt.f32 %v810_v3  ;;  %vm817_vm8 = vweird.f32 %v810_v3 }
 0x56a   : > { %v1100_v5 = vpop.eup %1099 }
 0x56b   : > { %v812_v6 = vmul.f32 %v1100_v5, %v810_v3  ;;  %vm818_vm7 = vweird.f32 %v1100_v5 }
 0x56c   : > { %vm819_vm9 = vmor %vm817_vm8, %vm818_vm7 }
 0x56d   : > { %v813_v7 = vmul.f32 %v1100_v5, %v812_v6 }
 0x56f   : > { %v814_v8 = vmul.f32 0.5, %v813_v7 }
 0x571   : > { %v815_v9 = vsub.f32 1.5, %v814_v8 }
 0x573   : > { %v816_v10 = vmul.f32 %v1100_v5, %v815_v9 }
 0x575   : > { %v820_v12 = vsel %vm819_vm9, %v1100_v5, %v816_v10 }
 0x576   : > { %v821_v13 = vmul.f32 %v820_v12, %v804_v63 }
 0x578   : > { %v826_v15 = vmul.f32 %v1079_v11, %v821_v13 }
 0x57a   : > { %v831_v16 = vadd.f32 %v1080_v14, %v826_v15 }
 0x57c   : > { %832 = vst.msk [vmem:[%s390_s12] sm:$0xff] %vm400_vm0, %v831_v16 }
 0x57d   : > { %1248 = shalt.err (!%p1245_p8)
}
 0x57e   : > { %999 = dma.vmem_to_hbm [thread:$0]  (%p1436_p4), %s847_s23, 128, %s849_s25, %s834_s20  }
 0x57f PF: > { %s860_s22 = sand.u32 1, %s1287_s27   ;;  %p1653_p10 = scmp.ge.s32.totalorder %s1299_s30, 2 }
 0x580   : > { %s861_s17 = scalar_lea.sflag [#allocation5], %s860_s22 }
 0x581   : > { %p1016_p13 = pnand %p1653_p10, %p1440_p6 }
 0x583   : > { %p1017_p11 = pneg %p1016_p13 }
 0x585   : > { %1282 = dma.done.wait (%p1017_p11), %s861_s17, 128  }
 0x586   : > { %1284 = vsyncadd (%p1017_p11), %s861_s17, 4294967168  ;;  %s1654_s30 = sld [smem:[#allocation18_spill]]  ;;  %s1657_s27 = smov %s1291_s28 }
 0x587   : > { %s1655_s10 = sld [smem:[#allocation17_spill]] }
 0x588   : > { %s1656_s29 = sld [smem:[#allocation19_spill]] }
 0x58c   : > { %p25_p0 = scmp.ge.s32.totalorder %s1654_s30, 4  }
 0x58d   : > { %s1658_s28 = smov %s1655_s10 }
 0x58e   :  { %27 = sbr.rel (!%p25_p0) target bundleno = 11 (0xb), region = 118 }
 0x593   :  { %867 = vsyncpa [#allocation4], 1 }
 0x594   :  { %869 = vsyncpa [#allocation4 + $0x1], 1 }
 0x595   :  { %870 = vsyncpa [#allocation7], 1 }
 0x596   :  { %872 = vsyncpa [#allocation7 + $0x1], 1 }
 0x597   :  { %873 = vsyncpa [#allocation10], 1 }
 0x598   :  { %874 = vsyncpa [#allocation5], 1 }
 0x599   :  { %876 = vsyncpa [#allocation5 + $0x1], 1 }

</bundles_post_ra>
